<compile_context>
chip_gen: v7x
topology: tpu7x:2x2x1
jax: 0.10.0
libtpu: 0.0.40
codegen_flags: <defaults>
</compile_context>

<pallas_src>
import jax
import jax.numpy as jnp
from jax.experimental import pallas as pl
from jax.experimental.pallas import tpu as pltpu


def _input_norm_kernel(x_ref, g_ref, b_ref, o_ref):
    # x_ref: (TB, CHW_pad) block of flattened batch rows
    # g_ref: (1, CHW_pad)  gamma broadcast per element
    # b_ref: (1, CHW_pad)  beta flattened
    # o_ref: (TB, CHW_pad)
    o_ref[...] = (x_ref[...] * g_ref[...] + b_ref[...]).astype(o_ref.dtype)


def _round_up(v, m):
    return -(-v // m) * m


def input_norm(x, gamma, beta):
    """out[n,c,h,w] = gamma[c] * x[n,c,h,w] + beta[c,h,w]  (InputNorm.forward)."""
    n, c, h, w = x.shape
    chw = c * h * w
    itemsize = jnp.dtype(x.dtype).itemsize

    # Tiny inputs: pallas_call launch + single-step pipeline cost dominates and
    # n < 8 rows underfill sublanes; let XLA fuse the identical FMA instead.
    if n * chw * itemsize < (256 << 10):
        return (x * gamma.reshape(1, c, 1, 1).astype(x.dtype)
                + beta[None].astype(x.dtype)).astype(x.dtype)

    # ---- chip-aware knobs (best-effort detection; safe defaults otherwise) --
    try:
        kind = jax.devices()[0].device_kind.lower()
    except Exception:
        kind = ""
    is_v7 = "v7" in kind
    target = (8 << 20) if is_v7 else (4 << 20)      # bytes of x per grid step

    # bf16 params only on chips with a native bf16 VALU (v6e/v7x); f32 else.
    if x.dtype == jnp.bfloat16 and ("v6" in kind or "v7" in kind):
        param_dtype = jnp.bfloat16
    else:
        param_dtype = jnp.float32

    # ---- lane-dense flattened layout, padded to a 128-lane multiple ---------
    chw_pad = _round_up(chw, 128)
    pad = chw_pad - chw
    x2 = x.reshape(n, chw)
    g2 = jnp.broadcast_to(
        gamma.astype(param_dtype)[:, None], (c, h * w)
    ).reshape(1, chw)
    b2 = beta.astype(param_dtype).reshape(1, chw)
    if pad:
        x2 = jnp.pad(x2, ((0, 0), (0, pad)))
        g2 = jnp.pad(g2, ((0, 0), (0, pad)))
        b2 = jnp.pad(b2, ((0, 0), (0, pad)))

    # ---- batch-tile size: dtype-packed sublane multiple, >= 2 grid steps ----
    sub = 8 * max(1, 4 // itemsize)                 # 8 f32 / 16 bf16 / 32 int8
    row_bytes = chw_pad * itemsize
    rows_per_target = max(sub, ((target // max(1, row_bytes)) // sub) * sub)
    if n <= rows_per_target:
        if n >= 2 * sub:
            # Split the batch into ~2 steps so both v7x TensorCores get work
            # and input/output DMAs pipeline; tb stays a sublane multiple.
            tb = min(_round_up(-(-n // 2), sub), n)
        else:
            tb = n                                  # full dim satisfies (8,128)
    else:
        tb = rows_per_target
    grid = (pl.cdiv(n, tb),)

    out = pl.pallas_call(
        _input_norm_kernel,
        out_shape=jax.ShapeDtypeStruct((n, chw_pad), x.dtype),
        grid=grid,
        in_specs=[
            pl.BlockSpec((tb, chw_pad), lambda i: (i, 0)),
            pl.BlockSpec((1, chw_pad), lambda i: (0, 0)),
            pl.BlockSpec((1, chw_pad), lambda i: (0, 0)),
        ],
        out_specs=pl.BlockSpec((tb, chw_pad), lambda i: (i, 0)),
        compiler_params=pltpu.CompilerParams(
            dimension_semantics=("parallel",),
            # Double-buffered in+out blocks: ~16 MiB (4 MiB blocks) or ~32 MiB
            # (8 MiB on v7x). 48 MiB covers both, exceeds v5e's 16 MiB scoped
            # default, and stays well under v7x's 64 MiB physical VMEM.
            vmem_limit_bytes=48 << 20,
        ),
        cost_estimate=pl.CostEstimate(
            flops=2 * n * chw,
            transcendentals=0,
            bytes_accessed=(2 * n * chw * itemsize
                            + 2 * chw * jnp.dtype(param_dtype).itemsize),
        ),
    )(x2, g2, b2)

    if pad:
        out = out[:, :chw]
    return out.reshape(n, c, h, w)


def _reference(x, gamma, beta):
    # Pure-JAX reference matching the PyTorch forward exactly.
    return x * gamma[None, :, None, None] + beta[None]


if __name__ == "__main__":
    key = jax.random.PRNGKey(0)
    kx, kg, kb = jax.random.split(key, 3)

    # num_channel == 3 branch, small shape (takes the tiny-input fast path).
    n, c, h, w = 2, 3, 16, 16
    x = jax.random.normal(kx, (n, c, h, w), dtype=jnp.float32)
    gamma = jax.random.normal(kg, (c,), dtype=jnp.float32)
    beta = jax.random.normal(kb, (c, h, w), dtype=jnp.float32)
    out = jax.block_until_ready(input_norm(x, gamma, beta))
    assert out.shape == x.shape, out.shape
    assert jnp.allclose(out, _reference(x, gamma, beta), atol=1e-5, rtol=1e-5), \
        "mismatch (C=3 branch, small)"

    # num_channel == 1 branch (gamma * x + beta).
    x1 = jax.random.normal(kx, (n, 1, h, w), dtype=jnp.float32)
    g1 = jnp.full((1,), 1.5, dtype=jnp.float32)
    b1 = jax.random.normal(kb, (1, h, w), dtype=jnp.float32)
    out1 = jax.block_until_ready(input_norm(x1, g1, b1))
    assert jnp.allclose(out1, _reference(x1, g1, b1), atol=1e-5, rtol=1e-5), \
        "mismatch (C=1 branch)"

    # Larger batch (still small/fast): exercises the Pallas kernel proper,
    # including the lane-padding path (3*28*28 = 2352 is not a 128 multiple)
    # and the >=2-grid-step split.
    n2, c2, h2, w2 = 256, 3, 28, 28
    xl = jax.random.normal(kx, (n2, c2, h2, w2), dtype=jnp.float32)
    gl = jax.random.normal(kg, (c2,), dtype=jnp.float32)
    bl = jax.random.normal(kb, (c2, h2, w2), dtype=jnp.float32)
    outl = jax.block_until_ready(input_norm(xl, gl, bl))
    assert outl.shape == xl.shape, outl.shape
    assert jnp.allclose(outl, _reference(xl, gl, bl), atol=1e-5, rtol=1e-5), \
        "mismatch (C=3 branch, Pallas path)"

    print("KERNEL_OK")
</pallas_src>

<mosaic_0001>
module attributes {stable_mosaic.version = 11 : i64} {
  func.func @_input_norm_kernel(%arg0: i32, %arg1: memref<128x2432xf32, #tpu.memory_space<vmem>>, %arg2: memref<1x2432xf32, #tpu.memory_space<vmem>>, %arg3: memref<1x2432xf32, #tpu.memory_space<vmem>>, %arg4: memref<128x2432xf32, #tpu.memory_space<vmem>>) attributes {dimension_semantics = [#tpu.dimension_semantics<parallel>], iteration_bounds = array<i64: 2>, scalar_prefetch = 0 : i64, scratch_operands = 0 : i64, tpu.core_type = #tpu.core_type<tc>, window_params = [{transform_indices = @transform_0, window_bounds = array<i64: 128, 2432>}, {pipeline_mode = #tpu.pipeline_mode<synchronous>, transform_indices = @transform_1, window_bounds = array<i64: 1, 2432>}, {pipeline_mode = #tpu.pipeline_mode<synchronous>, transform_indices = @transform_2, window_bounds = array<i64: 1, 2432>}, {transform_indices = @transform_3, window_bounds = array<i64: 128, 2432>}]} {
    %c0 = arith.constant 0 : index
    %c0_0 = arith.constant 0 : index
    %0 = vector.load %arg1[%c0, %c0_0] : memref<128x2432xf32, #tpu.memory_space<vmem>>, vector<128x2432xf32>
    %c0_1 = arith.constant 0 : index
    %c0_2 = arith.constant 0 : index
    %1 = vector.load %arg2[%c0_1, %c0_2] : memref<1x2432xf32, #tpu.memory_space<vmem>>, vector<1x2432xf32>
    %2 = vector.broadcast %1 : vector<1x2432xf32> to vector<128x2432xf32>
    %3 = arith.mulf %0, %2 : vector<128x2432xf32>
    %c0_3 = arith.constant 0 : index
    %c0_4 = arith.constant 0 : index
    %4 = vector.load %arg3[%c0_3, %c0_4] : memref<1x2432xf32, #tpu.memory_space<vmem>>, vector<1x2432xf32>
    %5 = vector.broadcast %4 : vector<1x2432xf32> to vector<128x2432xf32>
    %6 = arith.addf %3, %5 : vector<128x2432xf32>
    %c0_5 = arith.constant 0 : index
    %c0_6 = arith.constant 0 : index
    %7 = vector.load %arg4[%c0_5, %c0_6] : memref<128x2432xf32, #tpu.memory_space<vmem>>, vector<128x2432xf32>
    tpu.vector_store %arg4[%c0_5, %c0_6], %6 {strides = array<i32>} : memref<128x2432xf32, #tpu.memory_space<vmem>>, vector<128x2432xf32>,
    return
  }
  func.func @transform_0(%arg0: i32) -> (i32, i32) {
    %c0_i32 = arith.constant 0 : i32
    %c0_i32_0 = arith.constant 0 : i32
    return %arg0, %c0_i32 : i32, i32
  }
  func.func @transform_1(%arg0: i32) -> (i32, i32) {
    %c0_i32 = arith.constant 0 : i32
    %c0_i32_0 = arith.constant 0 : i32
    %c0_i32_1 = arith.constant 0 : i32
    return %c0_i32, %c0_i32_0 : i32, i32
  }
  func.func @transform_2(%arg0: i32) -> (i32, i32) {
    %c0_i32 = arith.constant 0 : i32
    %c0_i32_0 = arith.constant 0 : i32
    %c0_i32_1 = arith.constant 0 : i32
    return %c0_i32, %c0_i32_0 : i32, i32
  }
  func.func @transform_3(%arg0: i32) -> (i32, i32) {
    %c0_i32 = arith.constant 0 : i32
    %c0_i32_0 = arith.constant 0 : i32
    return %arg0, %c0_i32 : i32, i32
  }
}

</mosaic_0001>

<bundles_post_ra>
// kernel: tpu_custom_call.1
= control target key start
LH: loop header
LB: loop body
LE: loop exit
PB: predicated region body
PF: predicated region fallthrough
CT: control target
= control target key end

     0   :  { %8 = vsyncpa [#allocation3], 0  ;;  %s3616_s0 = inlined_call_operand.hbm [shape: f32[256,2432], index: 0, kind: input, shape index: {}]   ;;  %s3617_s1 = inlined_call_operand.hbm [shape: f32[1,2432], index: 1, kind: input, shape index: {}]   ;;  %s3618_s2 = inlined_call_operand.hbm [shape: f32[1,2432], index: 2, kind: input, shape index: {}]   ;;  %s3619_s3 = inlined_call_operand.hbm [shape: f32[256,2432], index: 3, kind: output, shape index: {}]  }
   0x1   :  { %10 = vsyncpa [#allocation3 + $0x1], 0 }
   0x2   :  { %11 = vsyncpa [#allocation6], 0 }
   0x3   :  { %12 = vsyncpa [#allocation4], 0 }
   0x4   :  { %14 = vsyncpa [#allocation4 + $0x1], 0  ;;  %s2019_s12 = smov 0   ;;  %s2021_s13 = smov 0  }
   0x5   :  { %s2023_s14 = smov 0   ;;  %s2025_s15 = smov 0  }
   0x6 LB: > { %s2040_s16 = sadd.s32 4294967295, %s1989_s15   ;;  %s1742_s17 = sadd.s32 4294967294, %s1989_s15   ;;  %s1989_s15 = sphi %s2025_s15, %s3644_s15   ;;  %s1985_s14 = sphi %s2023_s14, %s3643_s14   ;;  %s1981_s13 = sphi %s2021_s13, %s3642_s13   ;;  %s1977_s12 = sphi %s2019_s12, %s3641_s12  }
   0x7   : > { %s2044_s18 = sadd.s32 1, %s1989_s15   ;;  %s27_s19 = sadd.s32 1, %s1985_s14 }
   0x8   : > { %s24_s20 = ssub.s32 %s1989_s15, %s2044_s18  ;;  %p34_p0 = scmp.ne.s32.totalorder %s1985_s14, %s1981_s13 }
   0x9   : > { %p25_p1 = scmp.eq.s32.totalorder %s24_s20, 0  ;;  %p35_p2 = scmp.eq.s32.totalorder %s1989_s15, 0 }
   0xa   : > { %p40_p3 = scmp.ne.s32.totalorder %s1981_s13, %s1977_s12  ;;  %p3620_p4 = scmp.eq.s32.totalorder %s2040_s16, 0 }
   0xb   : > { %s2056_s21 = scalar_select %p25_p1, %s1985_s14, %s27_s19  }
   0xc   : > { %p2058_p5 = por %p35_p2, %p34_p0  ;;  %p2064_p6 = por %p3620_p4, %p40_p3 }
   0xd   : > { %p106_p7 = scmp.eq.s32.totalorder %s2040_s16, 1  ;;  %p112_p8 = scmp.eq.s32.totalorder %s1742_s17, 1 }
   0xe   : > { %s3626_s23 = scalar_select %p2064_p6, 1, 0 }
   0xf   : > { %p1743_p9 = scmp.ge.s32.totalorder %s1989_s15, 1  ;;  %p119_p10 = scmp.lt.s32.totalorder %s1989_s15, 3 }
  0x10   : > { %p2071_p11 = por %p106_p7, %p34_p0  ;;  %p2075_p12 = por %p112_p8, %p40_p3 }
  0x11   : > { %p2079_p13 = pnand %p1743_p9, %p119_p10  ;;  %s1991_s27 = smov [#allocation5]  }
  0x12   : > { %s3627_s24 = scalar_select %p2071_p11, 1, 0 }
  0x13   : > { %s3628_s25 = scalar_select %p2075_p12, 1, 0 }
  0x14   : > { %s3629_s26 = scalar_select %p2079_p13, 1, 0 }
  0x15   : > { %p1774_p2 = pneg %p2079_p13  ;;  %s132_s28 = sshll.u32 %s1991_s27, 4  ;;  %s133_s28 = int_to_ptr.vmem [resolvable:$true] %s132_s28 }
  0x16   : > { %p1791_p4 = scmp.lt.s32.totalorder %s1989_s15, 2  ;;  %p3630_p0 = scmp.eq.s32.totalorder %s2040_s16, 0 }
  0x17   : > { %s1992_s4 = smov [#allocation7]   ;;  %s1833_s8 = scalar_lea.hbm %s3617_s1, 304 }
  0x18   : > { %p2089_p7 = pnand %p1774_p2, %p3630_p0  ;;  %p2095_p3 = pnand %p1791_p4, %p2058_p5 }
  0x19   : > { %s143_s5 = sshll.u32 %s1992_s4, 4  ;;  %p1834_p8 = scmp.ne.s32.totalorder %s3617_s1, %s1833_s8  ;;  %s2099_s5 = int_to_ptr.vmem [resolvable:$true] %s143_s5 }
  0x1a   : > { %s3632_s30 = scalar_select %p2095_p3, 1, 0 }
  0x1b   : > { %p1835_p9 = pneg %p2089_p7  ;;  %p1840_p10 = scmp.lt.u32.totalorder %s1833_s8, %s3617_s1 }
  0x1d   : > { %p1836_p4 = pnand %p1835_p9, %p1834_p8 }
  0x1f   : > { %p1837_p5 = pneg %p1836_p4 }
  0x21   : > { %p1842_p2 = pnand %p1840_p10, %p1837_p5 }
  0x23   : > { %1845 = shalt.err (!%p1842_p2)
}
  0x24   : > { %s1846_s19 = scalar_lea.vmem %s133_s28, 304  ;;  %s1853_s20 = scalar_lea.vmem %s133_s28, 320 }
  0x25   : > { %p1847_p0 = scmp.ne.s32.totalorder %s133_s28, %s1846_s19  ;;  %p1854_p11 = scmp.lt.s32.totalorder %s133_s28, %s133_s28 }
  0x26   : > { %p1855_p6 = scmp.lt.s32.totalorder %s1853_s20, %s1846_s19 }
  0x27   : > { %p1849_p1 = pnand %p1847_p0, %p1835_p9 }
  0x28   : > { %p1856_p13 = por %p1855_p6, %p1854_p11 }
  0x29   : > { %p1850_p12 = pneg %p1849_p1 }
  0x2b   : > { %p1857_p3 = pnand %p1856_p13, %p1850_p12 }
  0x2d   : > { %1860 = shalt.err (!%p1857_p3)
}
  0x2e   : > { %1777 = dma.hbm_to_vmem [thread:$0]  (!%p2089_p7), %s3617_s1, 304, %s133_s28, [#allocation6]  }
  0x2f   : > { %s154_s4 = sand.u32 1, %s1985_s14   ;;  %s1861_s8 = scalar_lea.hbm %s3618_s2, 304 }
  0x30   : > { %p1862_p1 = scmp.ne.s32.totalorder %s3618_s2, %s1861_s8  ;;  %p1868_p12 = scmp.lt.u32.totalorder %s1861_s8, %s3618_s2 }
  0x32   : > { %p1864_p6 = pnand %p1862_p1, %p1835_p9 }
  0x34   : > { %p1865_p11 = pneg %p1864_p6 }
  0x36   : > { %p1870_p13 = pnand %p1868_p12, %p1865_p11 }
  0x38   : > { %1873 = shalt.err (!%p1870_p13)
}
  0x39   : > { %s1874_s28 = scalar_lea.vmem %s2099_s5, 304  ;;  %s1881_s19 = scalar_lea.vmem %s2099_s5, 320 }
  0x3a   : > { %p1875_p3 = scmp.ne.s32.totalorder %s2099_s5, %s1874_s28  ;;  %p1882_p5 = scmp.lt.s32.totalorder %s2099_s5, %s2099_s5 }
  0x3b   : > { %p1883_p10 = scmp.lt.s32.totalorder %s1881_s19, %s1874_s28 }
  0x3c   : > { %p1877_p8 = pnand %p1875_p3, %p1835_p9 }
  0x3d   : > { %p1884_p2 = por %p1883_p10, %p1882_p5 }
  0x3e   : > { %p1878_p4 = pneg %p1877_p8 }
  0x40   : > { %p1885_p0 = pnand %p1884_p2, %p1878_p4 }
  0x42   : > { %1888 = shalt.err (!%p1885_p0)
}
  0x43   : > { %1780 = dma.hbm_to_vmem [thread:$0]  (!%p2089_p7), %s3618_s2, 304, %s2099_s5, [#allocation6]  }
  0x44   : > { %s1758_s27 = smul.u32 2432, %s154_s4  ;;  %s2158_s11 = scalar_lea.sflag [#allocation3], %s154_s4 }
  0x45   : > { %s1759_s6 = smul.u32 38912, %s1989_s15  ;;  %p3633_p7 = scmp.ne.s32.totalorder %s3632_s30, 0 }
  0x46   : > { %s158_s29 = scalar_lea.vmem [#allocation2], %s1758_s27  ;;  %s1894_s19 = scalar_lea.hbm %s3616_s0, 77824 }
  0x47   : > { %s2154_s9 = scalar_lea.hbm %s3616_s0, %s1759_s6  ;;  %s166_s10 = sshll.u32 %s158_s29, 4  ;;  %s2156_s10 = int_to_ptr.vmem [resolvable:$true] %s166_s10 }
  0x48   : > { %s1889_s17 = scalar_lea.hbm %s2154_s9, 38912  ;;  %p1891_p1 = pneg %p3633_p7 }
  0x49   : > { %p1890_p9 = scmp.ne.s32.totalorder %s2154_s9, %s1889_s17  ;;  %p1895_p12 = scmp.lt.u32.totalorder %s2154_s9, %s3616_s0 }
  0x4a   : > { %p1896_p13 = scmp.lt.u32.totalorder %s1894_s19, %s1889_s17  ;;  %p1898_p8 = scmp.lt.u32.totalorder %s1889_s17, %s2154_s9 }
  0x4b   : > { %p1892_p6 = pnand %p1891_p1, %p1890_p9 }
  0x4c   : > { %p1897_p3 = por %p1896_p13, %p1895_p12 }
  0x4d   : > { %p1893_p11 = pneg %p1892_p6 }
  0x4e   : > { %p1899_p4 = por %p1898_p8, %p1897_p3 }
  0x50   : > { %p1900_p5 = pnand %p1899_p4, %p1893_p11 }
  0x52   : > { %1903 = shalt.err (!%p1900_p5)
}
  0x53   : > { %s1904_s4 = scalar_lea.vmem %s2156_s10, 38912  ;;  %s1993_s27 = smov [#allocation2]  }
  0x54   : > { %p1905_p10 = scmp.ne.s32.totalorder %s2156_s10, %s1904_s4  ;;  %s1909_s6 = sshll.u32 %s1993_s27, 4  ;;  %s1910_s6 = int_to_ptr.vmem [resolvable:$false] %s1909_s6 }
  0x55   : > { %s1911_s7 = scalar_lea.vmem %s1910_s6, 77824  ;;  %p1912_p9 = scmp.lt.s32.totalorder %s2156_s10, %s1910_s6 }
  0x56   : > { %p1907_p2 = pnand %p1905_p10, %p1891_p1  ;;  %p1913_p6 = scmp.lt.s32.totalorder %s1911_s7, %s1904_s4 }
  0x58   : > { %p1908_p0 = pneg %p1907_p2  ;;  %p1914_p12 = por %p1913_p6, %p1912_p9 }
  0x5a   : > { %p1915_p13 = pnand %p1914_p12, %p1908_p0 }
  0x5c   : > { %1918 = shalt.err (!%p1915_p13)
}
  0x5d   : > { %s1994_s8 = smov 2432   ;;  %s1995_s29 = smov 152  }
  0x5e   : > { %1784 = dma.hbm_to_vmem [thread:$0]  (!%p3633_p7), %s2154_s9, 38912, %s2156_s10, %s2158_s11, %s1994_s8, %s1994_s8, %s1995_s29  }
  0x5f   : > { %p3634_p1 = scmp.ne.s32.totalorder %s3629_s26, 0 }
  0x60   : > { %s2189_s17 = sand.u32 (!%p3634_p1), 1, %s1981_s13   ;;  %p3635_p11 = scmp.ne.s32.totalorder (!%p3634_p1), %s3626_s23, 0 }
  0x61   : > { %178 = sbr.rel (%p3634_p1) target bundleno = 322 (0x142), region = 32  ;;  %s181_s28 = scalar_lea.sflag (!%p3634_p1), [#allocation3], %s2189_s17 }
  0x62   : > { %s1760_s5 = smul.u32 (!%p3634_p1), 2432, %s2189_s17 }
  0x64   : > { %s2195_s19 = scalar_lea.vmem (!%p3634_p1), [#allocation2], %s1760_s5 }
  0x68   : > { %1964 = dma.done.wait (%p3635_p11), %s181_s28, 38912  }
  0x69   : > { %1966 = vsyncadd (%p3635_p11), %s181_s28, 4294928384  ;;  %p3636_p7 = scmp.eq.s32.totalorder %s2040_s16, 0 }
  0x6b   : > { %1968 = dma.done.wait (%p3636_p7), [#allocation6], 608   ;;  %p3637_p3 = pmov %p3636_p7 }
  0x6c   : > { %v527_v0 = vlaneseq  ;;  %v217_v7 = vld [vmem:[%s2195_s19] sm:$0xff]  ;;  %v926_v9 = vld [vmem:[#allocation7] sm:$0xff]  ;;  %v218_v15 = vld [vmem:[%s2195_s19 + $0x8] sm:$0xff]  ;;  %s2285_s23 = scalar_lea.vmem [#allocation8], %s1760_s5  ;;  %s1761_s26 = smul.u32 38912, %s2040_s16 }
  0x6d   : > { %1970 = vsyncadd (%p3637_p3), [#allocation6], 4294966688  ;;  %v521_v8 = vld [vmem:[#allocation5] sm:$0xff]  ;;  %v219_v18 = vld [vmem:[%s2195_s19 + $0x10] sm:$0xff]  ;;  %s1650_s30 = sshll.u32 %s2285_s23, 4  ;;  %s1636_s11 = scalar_lea.sflag [#allocation4], %s2189_s17  ;;  %s3562_s30 = int_to_ptr.vmem [resolvable:$true] %s1650_s30 }
  0x6e   : > { %v528_v1 = vshrl.u32 %v527_v0, 7  ;;  %v220_v19 = vld [vmem:[%s2195_s19 + $0x18] sm:$0xff]  ;;  %v221_v24 = vld [vmem:[%s2195_s19 + $0x20] sm:$0xff]  ;;  %v222_v29 = vld [vmem:[%s2195_s19 + $0x28] sm:$0xff]  ;;  %s3560_s10 = scalar_lea.hbm %s3619_s3, %s1761_s26  ;;  %s1919_s20 = scalar_lea.vmem %s3562_s30, 38912 }
  0x6f   : > { %v223_v34 = vld [vmem:[%s2195_s19 + $0x30] sm:$0xff]  ;;  %v522_v39 = vld [vmem:[#allocation5 + $0x8] sm:$0xff]  ;;  %v2274_v40 = vld [vmem:[#allocation7 + $0x8] sm:$0xff]  ;;  %p1920_p8 = scmp.ne.s32.totalorder %s3562_s30, %s1919_s20  ;;  %p3638_p4 = scmp.ne.s32.totalorder %s3627_s24, 0 }
  0x70   : > { %v2205_v2 = vsub.s32 0, %v528_v1  ;;  %v2207_v3 = vsub.s32 1, %v528_v1  ;;  %v2209_v4 = vsub.s32 2, %v528_v1  ;;  %v2211_v5 = vsub.s32 3, %v528_v1  ;;  %v224_v45 = vld [vmem:[%s2195_s19 + $0x38] sm:$0xff]  ;;  %v225_v50 = vld [vmem:[%s2195_s19 + $0x40] sm:$0xff] }
  0x71   : > { %v2213_v6 = vsub.s32 4, %v528_v1  ;;  %v2216_v10 = vsub.s32 5, %v528_v1  ;;  %v2218_v11 = vsub.s32 6, %v528_v1  ;;  %v2220_v12 = vsub.s32 7, %v528_v1  ;;  %v226_v51 = vld [vmem:[%s2195_s19 + $0x48] sm:$0xff]  ;;  %v227_v56 = vld [vmem:[%s2195_s19 + $0x50] sm:$0xff]  ;;  %p1921_p5 = pnand %p1920_p8, %p3638_p4 }
  0x72   : > { %v2223_v13 = vrot.slane %v521_v8, %v2205_v2  ;;  %v2226_v14 = vrot.slane %v926_v9, %v2205_v2  ;;  %v2230_v16 = vrot.slane %v521_v8, %v2207_v3  ;;  %v2233_v17 = vrot.slane %v926_v9, %v2207_v3  ;;  %v228_v61 = vld [vmem:[%s2195_s19 + $0x58] sm:$0xff]  ;;  %s1996_s22 = smov [#allocation8]  }
  0x73   : > { %v2238_v20 = vrot.slane %v521_v8, %v2209_v4  ;;  %v2241_v21 = vrot.slane %v926_v9, %v2209_v4  ;;  %v2244_v22 = vrot.slane %v521_v8, %v2211_v5  ;;  %v2247_v23 = vrot.slane %v926_v9, %v2211_v5  ;;  %p1922_p10 = pneg %p1921_p5  ;;  %s1923_s4 = sshll.u32 %s1996_s22, 4  ;;  %s1924_s4 = int_to_ptr.vmem [resolvable:$false] %s1923_s4 }
  0x74   : > { %v622_v25 = vmul.f32 %v2223_v13, %v217_v7  ;;  %v623_v26 = vmul.f32 %v2230_v16, %v218_v15  ;;  %v2253_v27 = vrot.slane %v521_v8, %v2213_v6  ;;  %v2256_v28 = vrot.slane %v926_v9, %v2213_v6  ;;  %v229_v7 = vld [vmem:[%s2195_s19 + $0x60] sm:$0xff]  ;;  %s1925_s27 = scalar_lea.vmem %s1924_s4, 77824  ;;  %p1926_p2 = scmp.lt.s32.totalorder %s3562_s30, %s1924_s4 }
  0x75   : > { %v624_v30 = vmul.f32 %v2238_v20, %v219_v18  ;;  %v625_v31 = vmul.f32 %v2244_v22, %v220_v19  ;;  %v2262_v32 = vrot.slane %v521_v8, %v2216_v10  ;;  %v2265_v33 = vrot.slane %v926_v9, %v2216_v10  ;;  %p1927_p0 = scmp.lt.s32.totalorder %s1925_s27, %s1919_s20 }
  0x76   : > { %v1027_v35 = vadd.f32 %v2226_v14, %v622_v25  ;;  %v1028_v36 = vadd.f32 %v2233_v17, %v623_v26  ;;  %v626_v37 = vmul.f32 %v2253_v27, %v221_v24  ;;  %v2272_v38 = vrot.slane %v521_v8, %v2218_v11 }
  0x77   : > { %v1029_v41 = vadd.f32 %v2241_v21, %v624_v30  ;;  %v1030_v42 = vadd.f32 %v2247_v23, %v625_v31  ;;  %v627_v43 = vmul.f32 %v2262_v32, %v222_v29  ;;  %v2280_v44 = vrot.slane %v926_v9, %v2218_v11  ;;  %v230_v29 = vld [vmem:[%s2195_s19 + $0x68] sm:$0xff]  ;;  %v523_v30 = vld [vmem:[#allocation5 + $0x10] sm:$0x7]  ;;  %p1928_p9 = por %p1927_p0, %p1926_p2 }
  0x78   : > { %1331 = vst [vmem:[%s2285_s23] sm:$0xff] %v1027_v35  ;;  %1332 = vst [vmem:[%s2285_s23 + $0x8] sm:$0xff] %v1028_v36  ;;  %v1031_v46 = vadd.f32 %v2256_v28, %v626_v37  ;;  %v628_v47 = vmul.f32 %v2272_v38, %v223_v34  ;;  %v2292_v48 = vrot.slane %v521_v8, %v2220_v12  ;;  %v231_v36 = vld [vmem:[%s2195_s19 + $0x70] sm:$0xff]  ;;  %v928_v37 = vld [vmem:[#allocation7 + $0x10] sm:$0x7] }
  0x79   : > { %v2295_v49 = vrot.slane %v926_v9, %v2220_v12  ;;  %1333 = vst [vmem:[%s2285_s23 + $0x10] sm:$0xff] %v1029_v41  ;;  %1334 = vst [vmem:[%s2285_s23 + $0x18] sm:$0xff] %v1030_v42  ;;  %v1032_v52 = vadd.f32 %v2265_v33, %v627_v43  ;;  %v2303_v53 = vrot.slane %v522_v39, %v2205_v2  ;;  %p1929_p6 = pnand %p1928_p9, %p1922_p10 }
  0x7a   : > { %v2307_v54 = vrot.slane %v2274_v40, %v2205_v2  ;;  %v2310_v55 = vrot.slane %v522_v39, %v2207_v3  ;;  %1335 = vst [vmem:[%s2285_s23 + $0x20] sm:$0xff] %v1031_v46  ;;  %v1033_v57 = vadd.f32 %v2280_v44, %v628_v47  ;;  %v629_v58 = vmul.f32 %v2292_v48, %v224_v45  ;;  %v233_v45 = vld [vmem:[%s2195_s19 + $0x80] sm:$0xff] }
  0x7b   : > { %v2318_v59 = vrot.slane %v2274_v40, %v2207_v3  ;;  %v2321_v60 = vrot.slane %v522_v39, %v2209_v4  ;;  %1336 = vst [vmem:[%s2285_s23 + $0x28] sm:$0xff] %v1032_v52  ;;  %v630_v62 = vmul.f32 %v2303_v53, %v225_v50  ;;  %v2329_v0 = vrot.slane %v2274_v40, %v2209_v4 }
  0x7c   : > { %v631_v63 = vmul.f32 %v2310_v55, %v226_v51  ;;  %v2332_v1 = vrot.slane %v522_v39, %v2211_v5  ;;  %1337 = vst [vmem:[%s2285_s23 + $0x30] sm:$0xff] %v1033_v57  ;;  %v1034_v8 = vadd.f32 %v2295_v49, %v629_v58  ;;  %v2340_v15 = vrot.slane %v2274_v40, %v2211_v5  ;;  %v237_v58 = vld [vmem:[%s2195_s19 + $0xa0] sm:$0xff] }
  0x7d   : > { %v632_v9 = vmul.f32 %v2321_v60, %v227_v56  ;;  %v2343_v18 = vrot.slane %v522_v39, %v2213_v6  ;;  %v1035_v19 = vadd.f32 %v2307_v54, %v630_v62  ;;  %v2350_v26 = vrot.slane %v2274_v40, %v2213_v6  ;;  %v232_v6 = vld [vmem:[%s2195_s19 + $0x78] sm:$0xff] }
  0x7e   : > { %v1036_v24 = vadd.f32 %v2318_v59, %v631_v63  ;;  %v633_v25 = vmul.f32 %v2332_v1, %v228_v61  ;;  %1338 = vst [vmem:[%s2285_s23 + $0x38] sm:$0xff] %v1034_v8  ;;  %v2357_v34 = vrot.slane %v522_v39, %v2216_v10  ;;  %v2361_v35 = vrot.slane %v2274_v40, %v2216_v10  ;;  %v239_v8 = vld [vmem:[%s2195_s19 + $0xb0] sm:$0xff] }
  0x7f   : > { %v1037_v5 = vadd.f32 %v2329_v0, %v632_v9  ;;  %v634_v31 = vmul.f32 %v2343_v18, %v229_v7  ;;  %1339 = vst [vmem:[%s2285_s23 + $0x40] sm:$0xff] %v1035_v19  ;;  %v2369_v42 = vrot.slane %v522_v39, %v2218_v11  ;;  %v2373_v43 = vrot.slane %v2274_v40, %v2218_v11  ;;  %v234_v11 = vld [vmem:[%s2195_s19 + $0x88] sm:$0xff]  ;;  %v240_v9 = vld [vmem:[%s2195_s19 + $0xb8] sm:$0xff] }
  0x80   : > { %1340 = vst [vmem:[%s2285_s23 + $0x48] sm:$0xff] %v1036_v24  ;;  %v1038_v41 = vadd.f32 %v2340_v15, %v633_v25  ;;  %v2376_v10 = vrot.slane %v522_v39, %v2220_v12  ;;  %v635_v47 = vmul.f32 %v2357_v34, %v230_v29  ;;  %v2384_v50 = vrot.slane %v2274_v40, %v2220_v12  ;;  %v235_v12 = vld [vmem:[%s2195_s19 + $0x90] sm:$0xff]  ;;  %v236_v40 = vld [vmem:[%s2195_s19 + $0x98] sm:$0xff]  ;;  %v238_v7 = vld [vmem:[%s2195_s19 + $0xa8] sm:$0xff] }
  0x81   : > { %1341 = vst [vmem:[%s2285_s23 + $0x50] sm:$0xff] %v1037_v5  ;;  %v1039_v46 = vadd.f32 %v2350_v26, %v634_v31  ;;  %v2387_v51 = vrot.slane %v523_v30, %v2205_v2  ;;  %v636_v39 = vmul.f32 %v2369_v42, %v231_v36  ;;  %v2394_v56 = vrot.slane %v928_v37, %v2205_v2 }
  0x82   : > { %1342 = vst [vmem:[%s2285_s23 + $0x58] sm:$0xff] %v1038_v41  ;;  %v637_v52 = vmul.f32 %v2376_v10, %v232_v6  ;;  %v2397_v57 = vrot.slane %v523_v30, %v2207_v3  ;;  %v1040_v61 = vadd.f32 %v2361_v35, %v635_v47  ;;  %v2406_v63 = vrot.slane %v928_v37, %v2207_v3  ;;  %v241_v3 = vld [vmem:[%s2195_s19 + $0xc0] sm:$0xff]  ;;  %v242_v6 = vld [vmem:[%s2195_s19 + $0xc8] sm:$0xff]  ;;  %v244_v47 = vld [vmem:[%s2195_s19 + $0xd8] sm:$0xff] }
  0x83   : > { %1343 = vst [vmem:[%s2285_s23 + $0x60] sm:$0xff] %v1039_v46  ;;  %v638_v62 = vmul.f32 %v2387_v51, %v233_v45  ;;  %v2409_v2 = vrot.slane %v523_v30, %v2209_v4  ;;  %v1041_v19 = vadd.f32 %v2373_v43, %v636_v39  ;;  %v2418_v29 = vrot.slane %v928_v37, %v2209_v4  ;;  %v243_v46 = vld [vmem:[%s2195_s19 + $0xd0] sm:$0xff] }
  0x84   : > { %v1042_v24 = vadd.f32 %v2384_v50, %v637_v52  ;;  %v639_v25 = vmul.f32 %v2397_v57, %v234_v11  ;;  %1344 = vst [vmem:[%s2285_s23 + $0x68] sm:$0xff] %v1040_v61  ;;  %v641_v31 = vmul.f32 %v2223_v13, %v236_v40  ;;  %v642_v36 = vmul.f32 %v2230_v16, %v237_v58  ;;  %v245_v11 = vld [vmem:[%s2195_s19 + $0xe0] sm:$0xff]  ;;  %v246_v58 = vld [vmem:[%s2195_s19 + $0xe8] sm:$0xff]  ;;  %v247_v61 = vld [vmem:[%s2195_s19 + $0xf0] sm:$0xff] }
  0x85   : > { %v1043_v30 = vadd.f32 %v2394_v56, %v638_v62  ;;  %v640_v5 = vmul.f32 %v2409_v2, %v235_v12  ;;  %1345 = vst [vmem:[%s2285_s23 + $0x70] sm:$0xff] %v1041_v19  ;;  %v643_v37 = vmul.f32 %v2238_v20, %v238_v7  ;;  %v644_v41 = vmul.f32 %v2244_v22, %v239_v8  ;;  %v248_v62 = vld [vmem:[%s2195_s19 + $0xf8] sm:$0xff] }
  0x86   : > { %1346 = vst [vmem:[%s2285_s23 + $0x78] sm:$0xff] %v1042_v24  ;;  %v1044_v4 = vadd.f32 %v2406_v63, %v639_v25  ;;  %v645_v45 = vmul.f32 %v2253_v27, %v240_v9  ;;  %v1046_v52 = vadd.f32 %v2226_v14, %v641_v31  ;;  %v1047_v12 = vadd.f32 %v2233_v17, %v642_v36  ;;  %v249_v24 = vld [vmem:[%s2195_s19 + $0x100] sm:$0xff]  ;;  %v250_v31 = vld [vmem:[%s2195_s19 + $0x108] sm:$0xff] }
  0x87   : > { %1347 = vst [vmem:[%s2285_s23 + $0x80] sm:$0xff] %v1043_v30  ;;  %v1045_v39 = vadd.f32 %v2418_v29, %v640_v5  ;;  %v646_v40 = vmul.f32 %v2262_v32, %v241_v3  ;;  %v1048_v7 = vadd.f32 %v2241_v21, %v643_v37  ;;  %v1049_v8 = vadd.f32 %v2247_v23, %v644_v41  ;;  %v251_v41 = vld [vmem:[%s2195_s19 + $0x110] sm:$0xff] }
  0x88   : > { %1348 = vst [vmem:[%s2285_s23 + $0x88] sm:$0xff] %v1044_v4  ;;  %v1050_v9 = vadd.f32 %v2256_v28, %v645_v45  ;;  %v647_v19 = vmul.f32 %v2272_v38, %v242_v6  ;;  %1350 = vst [vmem:[%s2285_s23 + $0x98] sm:$0xff] %v1046_v52  ;;  %v648_v3 = vmul.f32 %v2292_v48, %v243_v46  ;;  %v252_v45 = vld [vmem:[%s2195_s19 + $0x118] sm:$0xff]  ;;  %v253_v46 = vld [vmem:[%s2195_s19 + $0x120] sm:$0xff] }
  0x89   : > { %1349 = vst [vmem:[%s2285_s23 + $0x90] sm:$0xff] %v1045_v39  ;;  %1351 = vst [vmem:[%s2285_s23 + $0xa0] sm:$0xff] %v1047_v12  ;;  %v1051_v25 = vadd.f32 %v2265_v33, %v646_v40  ;;  %v649_v30 = vmul.f32 %v2303_v53, %v244_v47  ;;  %v650_v5 = vmul.f32 %v2310_v55, %v245_v11  ;;  %v254_v12 = vld [vmem:[%s2195_s19 + $0x128] sm:$0xff]  ;;  %v255_v40 = vld [vmem:[%s2195_s19 + $0x130] sm:$0xff] }
  0x8a   : > { %1352 = vst [vmem:[%s2285_s23 + $0xa8] sm:$0xff] %v1048_v7  ;;  %1353 = vst [vmem:[%s2285_s23 + $0xb0] sm:$0xff] %v1049_v8  ;;  %v1052_v36 = vadd.f32 %v2280_v44, %v647_v19  ;;  %v651_v6 = vmul.f32 %v2321_v60, %v246_v58  ;;  %v652_v4 = vmul.f32 %v2332_v1, %v247_v61  ;;  %v256_v58 = vld [vmem:[%s2195_s19 + $0x138] sm:$0xff] }
  0x8b   : > { %1354 = vst [vmem:[%s2285_s23 + $0xb8] sm:$0xff] %v1050_v9  ;;  %v653_v37 = vmul.f32 %v2343_v18, %v248_v62  ;;  %1355 = vst [vmem:[%s2285_s23 + $0xc0] sm:$0xff] %v1051_v25  ;;  %v1053_v47 = vadd.f32 %v2295_v49, %v648_v3  ;;  %v1054_v11 = vadd.f32 %v2307_v54, %v649_v30  ;;  %v257_v9 = vld [vmem:[%s2195_s19 + $0x140] sm:$0xff]  ;;  %v258_v30 = vld [vmem:[%s2195_s19 + $0x148] sm:$0xff] }
  0x8c   : > { %v1055_v39 = vadd.f32 %v2318_v59, %v650_v5  ;;  %v654_v52 = vmul.f32 %v2357_v34, %v249_v24  ;;  %1356 = vst [vmem:[%s2285_s23 + $0xc8] sm:$0xff] %v1052_v36  ;;  %v1056_v61 = vadd.f32 %v2329_v0, %v651_v6  ;;  %v1057_v62 = vadd.f32 %v2340_v15, %v652_v4  ;;  %v259_v4 = vld [vmem:[%s2195_s19 + $0x150] sm:$0xff] }
  0x8d   : > { %v1058_v7 = vadd.f32 %v2350_v26, %v653_v37  ;;  %v655_v8 = vmul.f32 %v2369_v42, %v250_v31  ;;  %1357 = vst [vmem:[%s2285_s23 + $0xd0] sm:$0xff] %v1053_v47  ;;  %1358 = vst [vmem:[%s2285_s23 + $0xd8] sm:$0xff] %v1054_v11  ;;  %v656_v24 = vmul.f32 %v2376_v10, %v251_v41  ;;  %v260_v37 = vld [vmem:[%s2195_s19 + $0x158] sm:$0xff]  ;;  %v261_v41 = vld [vmem:[%s2195_s19 + $0x160] sm:$0xff] }
  0x8e   : > { %1359 = vst [vmem:[%s2285_s23 + $0xe0] sm:$0xff] %v1055_v39  ;;  %v1059_v19 = vadd.f32 %v2361_v35, %v654_v52  ;;  %v657_v25 = vmul.f32 %v2387_v51, %v252_v45  ;;  %v658_v3 = vmul.f32 %v2397_v57, %v253_v46  ;;  %1360 = vst [vmem:[%s2285_s23 + $0xe8] sm:$0xff] %v1056_v61  ;;  %v262_v39 = vld [vmem:[%s2195_s19 + $0x168] sm:$0xff]  ;;  %v263_v52 = vld [vmem:[%s2195_s19 + $0x170] sm:$0xff] }
  0x8f   : > { %1361 = vst [vmem:[%s2285_s23 + $0xf0] sm:$0xff] %v1057_v62  ;;  %1362 = vst [vmem:[%s2285_s23 + $0xf8] sm:$0xff] %v1058_v7  ;;  %v1060_v5 = vadd.f32 %v2373_v43, %v655_v8  ;;  %v659_v31 = vmul.f32 %v2409_v2, %v254_v12  ;;  %v660_v36 = vmul.f32 %v2223_v13, %v255_v40  ;;  %v264_v12 = vld [vmem:[%s2195_s19 + $0x178] sm:$0xff]  ;;  %v265_v7 = vld [vmem:[%s2195_s19 + $0x180] sm:$0xff] }
  0x90   : > { %v661_v6 = vmul.f32 %v2230_v16, %v256_v58  ;;  %1363 = vst [vmem:[%s2285_s23 + $0x100] sm:$0xff] %v1059_v19  ;;  %v1061_v45 = vadd.f32 %v2384_v50, %v656_v24  ;;  %v1062_v46 = vadd.f32 %v2394_v56, %v657_v25  ;;  %v1063_v47 = vadd.f32 %v2406_v63, %v658_v3  ;;  %v266_v25 = vld [vmem:[%s2195_s19 + $0x188] sm:$0xff] }
  0x91   : > { %v662_v11 = vmul.f32 %v2238_v20, %v257_v9  ;;  %1364 = vst [vmem:[%s2285_s23 + $0x108] sm:$0xff] %v1060_v5  ;;  %v1064_v40 = vadd.f32 %v2418_v29, %v659_v31  ;;  %v1065_v58 = vadd.f32 %v2226_v14, %v660_v36  ;;  %v663_v62 = vmul.f32 %v2244_v22, %v258_v30  ;;  %v267_v36 = vld [vmem:[%s2195_s19 + $0x190] sm:$0xff] }
  0x92   : > { %v1066_v61 = vadd.f32 %v2233_v17, %v661_v6  ;;  %1365 = vst [vmem:[%s2285_s23 + $0x110] sm:$0xff] %v1061_v45  ;;  %1366 = vst [vmem:[%s2285_s23 + $0x118] sm:$0xff] %v1062_v46  ;;  %v664_v9 = vmul.f32 %v2253_v27, %v259_v4  ;;  %v665_v19 = vmul.f32 %v2262_v32, %v260_v37  ;;  %v268_v6 = vld [vmem:[%s2195_s19 + $0x198] sm:$0xff]  ;;  %v269_v4 = vld [vmem:[%s2195_s19 + $0x1a0] sm:$0xff] }
  0x93   : > { %1367 = vst [vmem:[%s2285_s23 + $0x120] sm:$0xff] %v1063_v47  ;;  %v1067_v8 = vadd.f32 %v2241_v21, %v662_v11  ;;  %v666_v24 = vmul.f32 %v2272_v38, %v261_v41  ;;  %1368 = vst [vmem:[%s2285_s23 + $0x128] sm:$0xff] %v1064_v40  ;;  %v1068_v3 = vadd.f32 %v2247_v23, %v663_v62  ;;  %v270_v47 = vld [vmem:[%s2195_s19 + $0x1a8] sm:$0xff]  ;;  %v271_v11 = vld [vmem:[%s2195_s19 + $0x1b0] sm:$0xff] }
  0x94   : > { %1369 = vst [vmem:[%s2285_s23 + $0x130] sm:$0xff] %v1065_v58  ;;  %1370 = vst [vmem:[%s2285_s23 + $0x138] sm:$0xff] %v1066_v61  ;;  %v667_v30 = vmul.f32 %v2292_v48, %v262_v39  ;;  %v668_v5 = vmul.f32 %v2303_v53, %v263_v52  ;;  %v669_v31 = vmul.f32 %v2310_v55, %v264_v12  ;;  %v272_v39 = vld [vmem:[%s2195_s19 + $0x1b8] sm:$0xff]  ;;  %v273_v61 = vld [vmem:[%s2195_s19 + $0x1c0] sm:$0xff] }
  0x95   : > { %1371 = vst [vmem:[%s2285_s23 + $0x140] sm:$0xff] %v1067_v8  ;;  %v1069_v37 = vadd.f32 %v2256_v28, %v664_v9  ;;  %v1070_v41 = vadd.f32 %v2265_v33, %v665_v19  ;;  %v1071_v45 = vadd.f32 %v2280_v44, %v666_v24  ;;  %v670_v46 = vmul.f32 %v2321_v60, %v265_v7  ;;  %v274_v19 = vld [vmem:[%s2195_s19 + $0x1c8] sm:$0xff] }
  0x96   : > { %1372 = vst [vmem:[%s2285_s23 + $0x148] sm:$0xff] %v1068_v3  ;;  %v1072_v52 = vadd.f32 %v2295_v49, %v667_v30  ;;  %v1073_v12 = vadd.f32 %v2307_v54, %v668_v5  ;;  %v1074_v40 = vadd.f32 %v2318_v59, %v669_v31  ;;  %v671_v58 = vmul.f32 %v2332_v1, %v266_v25  ;;  %v275_v5 = vld [vmem:[%s2195_s19 + $0x1d0] sm:$0xff]  ;;  %v276_v31 = vld [vmem:[%s2195_s19 + $0x1d8] sm:$0xff] }
  0x97   : > { %1373 = vst [vmem:[%s2285_s23 + $0x150] sm:$0xff] %v1069_v37  ;;  %1374 = vst [vmem:[%s2285_s23 + $0x158] sm:$0xff] %v1070_v41  ;;  %v1075_v62 = vadd.f32 %v2329_v0, %v670_v46  ;;  %v672_v7 = vmul.f32 %v2343_v18, %v267_v36  ;;  %v673_v8 = vmul.f32 %v2357_v34, %v268_v6  ;;  %v277_v36 = vld [vmem:[%s2195_s19 + $0x1e0] sm:$0xff]  ;;  %v279_v46 = vld [vmem:[%s2195_s19 + $0x1f0] sm:$0xff] }
  0x98   : > { %1375 = vst [vmem:[%s2285_s23 + $0x160] sm:$0xff] %v1071_v45  ;;  %v674_v9 = vmul.f32 %v2369_v42, %v269_v4  ;;  %1376 = vst [vmem:[%s2285_s23 + $0x168] sm:$0xff] %v1072_v52  ;;  %v1076_v24 = vadd.f32 %v2340_v15, %v671_v58  ;;  %v675_v25 = vmul.f32 %v2376_v10, %v270_v47  ;;  %v278_v45 = vld [vmem:[%s2195_s19 + $0x1e8] sm:$0xff]  ;;  %v280_v47 = vld [vmem:[%s2195_s19 + $0x1f8] sm:$0xff] }
  0x99   : > { %1377 = vst [vmem:[%s2285_s23 + $0x170] sm:$0xff] %v1073_v12  ;;  %1378 = vst [vmem:[%s2285_s23 + $0x178] sm:$0xff] %v1074_v40  ;;  %v676_v3 = vmul.f32 %v2387_v51, %v271_v11  ;;  %v677_v30 = vmul.f32 %v2397_v57, %v272_v39  ;;  %v1077_v6 = vadd.f32 %v2350_v26, %v672_v7  ;;  %v281_v40 = vld [vmem:[%s2195_s19 + $0x200] sm:$0xff] }
  0x9a   : > { %1379 = vst [vmem:[%s2285_s23 + $0x180] sm:$0xff] %v1075_v62  ;;  %v1078_v4 = vadd.f32 %v2361_v35, %v673_v8  ;;  %v1079_v37 = vadd.f32 %v2373_v43, %v674_v9  ;;  %v678_v41 = vmul.f32 %v2409_v2, %v273_v61  ;;  %1380 = vst [vmem:[%s2285_s23 + $0x188] sm:$0xff] %v1076_v24  ;;  %v282_v8 = vld [vmem:[%s2195_s19 + $0x208] sm:$0xff] }
  0x9b   : > { %v1080_v11 = vadd.f32 %v2384_v50, %v675_v25  ;;  %v1081_v39 = vadd.f32 %v2394_v56, %v676_v3  ;;  %v1082_v52 = vadd.f32 %v2406_v63, %v677_v30  ;;  %v679_v12 = vmul.f32 %v2223_v13, %v274_v19  ;;  %1381 = vst [vmem:[%s2285_s23 + $0x190] sm:$0xff] %v1077_v6  ;;  %v283_v3 = vld [vmem:[%s2195_s19 + $0x210] sm:$0xff]  ;;  %v284_v30 = vld [vmem:[%s2195_s19 + $0x218] sm:$0xff] }
  0x9c   : > { %1382 = vst [vmem:[%s2285_s23 + $0x198] sm:$0xff] %v1078_v4  ;;  %1383 = vst [vmem:[%s2285_s23 + $0x1a0] sm:$0xff] %v1079_v37  ;;  %v1083_v58 = vadd.f32 %v2418_v29, %v678_v41  ;;  %v680_v61 = vmul.f32 %v2230_v16, %v275_v5  ;;  %v681_v62 = vmul.f32 %v2238_v20, %v276_v31  ;;  %v285_v5 = vld [vmem:[%s2195_s19 + $0x220] sm:$0xff]  ;;  %v286_v37 = vld [vmem:[%s2195_s19 + $0x228] sm:$0xff] }
  0x9d   : > { %v682_v7 = vmul.f32 %v2244_v22, %v277_v36  ;;  %1384 = vst [vmem:[%s2285_s23 + $0x1a8] sm:$0xff] %v1080_v11  ;;  %1385 = vst [vmem:[%s2285_s23 + $0x1b0] sm:$0xff] %v1081_v39  ;;  %v1084_v9 = vadd.f32 %v2226_v14, %v679_v12  ;;  %v683_v19 = vmul.f32 %v2253_v27, %v278_v45  ;;  %v287_v41 = vld [vmem:[%s2195_s19 + $0x230] sm:$0xff]  ;;  %v288_v45 = vld [vmem:[%s2195_s19 + $0x238] sm:$0xff] }
  0x9e   : > { %1386 = vst [vmem:[%s2285_s23 + $0x1b8] sm:$0xff] %v1082_v52  ;;  %v684_v24 = vmul.f32 %v2262_v32, %v279_v46  ;;  %v685_v25 = vmul.f32 %v2272_v38, %v280_v47  ;;  %1387 = vst [vmem:[%s2285_s23 + $0x1c0] sm:$0xff] %v1083_v58  ;;  %v1085_v31 = vadd.f32 %v2233_v17, %v680_v61  ;;  %v289_v52 = vld [vmem:[%s2195_s19 + $0x240] sm:$0xff] }
  0x9f   : > { %v1086_v36 = vadd.f32 %v2241_v21, %v681_v62  ;;  %v1087_v6 = vadd.f32 %v2247_v23, %v682_v7  ;;  %v686_v4 = vmul.f32 %v2292_v48, %v281_v40  ;;  %1388 = vst [vmem:[%s2285_s23 + $0x1c8] sm:$0xff] %v1084_v9  ;;  %v1088_v46 = vadd.f32 %v2256_v28, %v683_v19  ;;  %v290_v62 = vld [vmem:[%s2195_s19 + $0x248] sm:$0xff] }
  0xa0   : > { %v1089_v47 = vadd.f32 %v2265_v33, %v684_v24  ;;  %v1090_v11 = vadd.f32 %v2280_v44, %v685_v25  ;;  %v687_v39 = vmul.f32 %v2303_v53, %v282_v8  ;;  %1389 = vst [vmem:[%s2285_s23 + $0x1d0] sm:$0xff] %v1085_v31  ;;  %v688_v40 = vmul.f32 %v2310_v55, %v283_v3  ;;  %v291_v24 = vld [vmem:[%s2195_s19 + $0x250] sm:$0xff]  ;;  %v292_v25 = vld [vmem:[%s2195_s19 + $0x258] sm:$0xff]  ;;  %v293_v3 = vld [vmem:[%s2195_s19 + $0x260] sm:$0xff] }
  0xa1   : > { %1390 = vst [vmem:[%s2285_s23 + $0x1d8] sm:$0xff] %v1086_v36  ;;  %1391 = vst [vmem:[%s2285_s23 + $0x1e0] sm:$0xff] %v1087_v6  ;;  %v1091_v12 = vadd.f32 %v2295_v49, %v686_v4  ;;  %v689_v58 = vmul.f32 %v2321_v60, %v284_v30  ;;  %v690_v61 = vmul.f32 %v2332_v1, %v285_v5  ;;  %v294_v6 = vld [vmem:[%s2195_s19 + $0x268] sm:$0xff]  ;;  %v295_v4 = vld [vmem:[%s2195_s19 + $0x270] sm:$0xff] }
  0xa2   : > { %1392 = vst [vmem:[%s2285_s23 + $0x1e8] sm:$0xff] %v1088_v46  ;;  %1393 = vst [vmem:[%s2285_s23 + $0x1f0] sm:$0xff] %v1089_v47  ;;  %v1092_v7 = vadd.f32 %v2307_v54, %v687_v39  ;;  %v691_v8 = vmul.f32 %v2343_v18, %v286_v37  ;;  %v692_v9 = vmul.f32 %v2357_v34, %v287_v41  ;;  %v296_v37 = vld [vmem:[%s2195_s19 + $0x278] sm:$0xff] }
  0xa3   : > { %1394 = vst [vmem:[%s2285_s23 + $0x1f8] sm:$0xff] %v1090_v11  ;;  %v693_v19 = vmul.f32 %v2369_v42, %v288_v45  ;;  %1395 = vst [vmem:[%s2285_s23 + $0x200] sm:$0xff] %v1091_v12  ;;  %v1093_v30 = vadd.f32 %v2318_v59, %v688_v40  ;;  %v1094_v5 = vadd.f32 %v2329_v0, %v689_v58  ;;  %v297_v11 = vld [vmem:[%s2195_s19 + $0x280] sm:$0xff]  ;;  %v298_v58 = vld [vmem:[%s2195_s19 + $0x288] sm:$0xff] }
  0xa4   : > { %v1095_v31 = vadd.f32 %v2340_v15, %v690_v61  ;;  %v694_v36 = vmul.f32 %v2376_v10, %v289_v52  ;;  %1396 = vst [vmem:[%s2285_s23 + $0x208] sm:$0xff] %v1092_v7  ;;  %v1096_v41 = vadd.f32 %v2350_v26, %v691_v8  ;;  %v1097_v45 = vadd.f32 %v2361_v35, %v692_v9  ;;  %v299_v9 = vld [vmem:[%s2195_s19 + $0x290] sm:$0xff] }
  0xa5   : > { %v1098_v46 = vadd.f32 %v2373_v43, %v693_v19  ;;  %v695_v47 = vmul.f32 %v2387_v51, %v290_v62  ;;  %1397 = vst [vmem:[%s2285_s23 + $0x210] sm:$0xff] %v1093_v30  ;;  %1398 = vst [vmem:[%s2285_s23 + $0x218] sm:$0xff] %v1094_v5  ;;  %v696_v52 = vmul.f32 %v2397_v57, %v291_v24  ;;  %v300_v19 = vld [vmem:[%s2195_s19 + $0x298] sm:$0xff]  ;;  %v301_v24 = vld [vmem:[%s2195_s19 + $0x2a0] sm:$0xff] }
  0xa6   : > { %1399 = vst [vmem:[%s2285_s23 + $0x220] sm:$0xff] %v1095_v31  ;;  %v1099_v39 = vadd.f32 %v2384_v50, %v694_v36  ;;  %v697_v12 = vmul.f32 %v2409_v2, %v292_v25  ;;  %v698_v40 = vmul.f32 %v2223_v13, %v293_v3  ;;  %1400 = vst [vmem:[%s2285_s23 + $0x228] sm:$0xff] %v1096_v41  ;;  %v302_v31 = vld [vmem:[%s2195_s19 + $0x2a8] sm:$0xff]  ;;  %v303_v36 = vld [vmem:[%s2195_s19 + $0x2b0] sm:$0xff] }
  0xa7   : > { %1401 = vst [vmem:[%s2285_s23 + $0x230] sm:$0xff] %v1097_v45  ;;  %1402 = vst [vmem:[%s2285_s23 + $0x238] sm:$0xff] %v1098_v46  ;;  %v1100_v61 = vadd.f32 %v2394_v56, %v695_v47  ;;  %v699_v62 = vmul.f32 %v2230_v16, %v294_v6  ;;  %v700_v7 = vmul.f32 %v2238_v20, %v295_v4  ;;  %v304_v6 = vld [vmem:[%s2195_s19 + $0x2b8] sm:$0xff]  ;;  %v305_v46 = vld [vmem:[%s2195_s19 + $0x2c0] sm:$0xff] }
  0xa8   : > { %v701_v8 = vmul.f32 %v2244_v22, %v296_v37  ;;  %1403 = vst [vmem:[%s2285_s23 + $0x240] sm:$0xff] %v1099_v39  ;;  %v1101_v25 = vadd.f32 %v2406_v63, %v696_v52  ;;  %v1102_v3 = vadd.f32 %v2418_v29, %v697_v12  ;;  %v1103_v30 = vadd.f32 %v2226_v14, %v698_v40  ;;  %v306_v12 = vld [vmem:[%s2195_s19 + $0x2c8] sm:$0xff] }
  0xa9   : > { %v702_v5 = vmul.f32 %v2253_v27, %v297_v11  ;;  %1404 = vst [vmem:[%s2285_s23 + $0x248] sm:$0xff] %v1100_v61  ;;  %v1104_v4 = vadd.f32 %v2233_v17, %v699_v62  ;;  %v1105_v37 = vadd.f32 %v2241_v21, %v700_v7  ;;  %v703_v45 = vmul.f32 %v2262_v32, %v298_v58  ;;  %v307_v7 = vld [vmem:[%s2195_s19 + $0x2d0] sm:$0xff] }
  0xaa   : > { %v1106_v41 = vadd.f32 %v2247_v23, %v701_v8  ;;  %1405 = vst [vmem:[%s2285_s23 + $0x250] sm:$0xff] %v1101_v25  ;;  %1406 = vst [vmem:[%s2285_s23 + $0x258] sm:$0xff] %v1102_v3  ;;  %v704_v11 = vmul.f32 %v2272_v38, %v299_v9  ;;  %v705_v39 = vmul.f32 %v2292_v48, %v300_v19  ;;  %v308_v8 = vld [vmem:[%s2195_s19 + $0x2d8] sm:$0xff]  ;;  %v309_v9 = vld [vmem:[%s2195_s19 + $0x2e0] sm:$0xff] }
  0xab   : > { %1407 = vst [vmem:[%s2285_s23 + $0x260] sm:$0xff] %v1103_v30  ;;  %v1107_v47 = vadd.f32 %v2256_v28, %v702_v5  ;;  %v706_v52 = vmul.f32 %v2303_v53, %v301_v24  ;;  %1408 = vst [vmem:[%s2285_s23 + $0x268] sm:$0xff] %v1104_v4  ;;  %v1108_v40 = vadd.f32 %v2265_v33, %v703_v45  ;;  %v310_v30 = vld [vmem:[%s2195_s19 + $0x2e8] sm:$0xff]  ;;  %v311_v5 = vld [vmem:[%s2195_s19 + $0x2f0] sm:$0xff] }
  0xac   : > { %1409 = vst [vmem:[%s2285_s23 + $0x270] sm:$0xff] %v1105_v37  ;;  %1410 = vst [vmem:[%s2285_s23 + $0x278] sm:$0xff] %v1106_v41  ;;  %v707_v58 = vmul.f32 %v2310_v55, %v302_v31  ;;  %v708_v61 = vmul.f32 %v2321_v60, %v303_v36  ;;  %v709_v62 = vmul.f32 %v2332_v1, %v304_v6  ;;  %v312_v31 = vld [vmem:[%s2195_s19 + $0x2f8] sm:$0xff]  ;;  %v313_v41 = vld [vmem:[%s2195_s19 + $0x300] sm:$0xff] }
  0xad   : > { %1411 = vst [vmem:[%s2285_s23 + $0x280] sm:$0xff] %v1107_v47  ;;  %v1109_v19 = vadd.f32 %v2280_v44, %v704_v11  ;;  %v1110_v24 = vadd.f32 %v2295_v49, %v705_v39  ;;  %v1111_v25 = vadd.f32 %v2307_v54, %v706_v52  ;;  %v710_v3 = vmul.f32 %v2343_v18, %v305_v46  ;;  %v314_v39 = vld [vmem:[%s2195_s19 + $0x308] sm:$0xff] }
  0xae   : > { %1412 = vst [vmem:[%s2285_s23 + $0x288] sm:$0xff] %v1108_v40  ;;  %v1112_v36 = vadd.f32 %v2318_v59, %v707_v58  ;;  %v1113_v6 = vadd.f32 %v2329_v0, %v708_v61  ;;  %v1114_v4 = vadd.f32 %v2340_v15, %v709_v62  ;;  %v711_v37 = vmul.f32 %v2357_v34, %v306_v12  ;;  %v315_v61 = vld [vmem:[%s2195_s19 + $0x310] sm:$0xff]  ;;  %v316_v62 = vld [vmem:[%s2195_s19 + $0x318] sm:$0xff] }
  0xaf   : > { %1413 = vst [vmem:[%s2285_s23 + $0x290] sm:$0xff] %v1109_v19  ;;  %1414 = vst [vmem:[%s2285_s23 + $0x298] sm:$0xff] %v1110_v24  ;;  %v1115_v45 = vadd.f32 %v2350_v26, %v710_v3  ;;  %v712_v46 = vmul.f32 %v2369_v42, %v307_v7  ;;  %v713_v47 = vmul.f32 %v2376_v10, %v308_v8  ;;  %v317_v7 = vld [vmem:[%s2195_s19 + $0x320] sm:$0xff]  ;;  %v319_v3 = vld [vmem:[%s2195_s19 + $0x330] sm:$0xff] }
  0xb0   : > { %1415 = vst [vmem:[%s2285_s23 + $0x2a0] sm:$0xff] %v1111_v25  ;;  %v714_v11 = vmul.f32 %v2387_v51, %v309_v9  ;;  %1416 = vst [vmem:[%s2285_s23 + $0x2a8] sm:$0xff] %v1112_v36  ;;  %v1116_v52 = vadd.f32 %v2361_v35, %v711_v37  ;;  %v715_v12 = vmul.f32 %v2397_v57, %v310_v30  ;;  %v318_v25 = vld [vmem:[%s2195_s19 + $0x328] sm:$0xff]  ;;  %v320_v30 = vld [vmem:[%s2195_s19 + $0x338] sm:$0xff] }
  0xb1   : > { %1417 = vst [vmem:[%s2285_s23 + $0x2b0] sm:$0xff] %v1113_v6  ;;  %1418 = vst [vmem:[%s2285_s23 + $0x2b8] sm:$0xff] %v1114_v4  ;;  %v716_v40 = vmul.f32 %v2409_v2, %v311_v5  ;;  %v717_v58 = vmul.f32 %v2223_v13, %v312_v31  ;;  %v1117_v8 = vadd.f32 %v2373_v43, %v712_v46  ;;  %v321_v4 = vld [vmem:[%s2195_s19 + $0x340] sm:$0xff] }
  0xb2   : > { %1419 = vst [vmem:[%s2285_s23 + $0x2c0] sm:$0xff] %v1115_v45  ;;  %v1118_v9 = vadd.f32 %v2384_v50, %v713_v47  ;;  %v1119_v19 = vadd.f32 %v2394_v56, %v714_v11  ;;  %v718_v24 = vmul.f32 %v2230_v16, %v313_v41  ;;  %1420 = vst [vmem:[%s2285_s23 + $0x2c8] sm:$0xff] %v1116_v52  ;;  %v322_v47 = vld [vmem:[%s2195_s19 + $0x348] sm:$0xff] }
  0xb3   : > { %v1120_v5 = vadd.f32 %v2406_v63, %v715_v12  ;;  %v1121_v31 = vadd.f32 %v2418_v29, %v716_v40  ;;  %v1122_v36 = vadd.f32 %v2226_v14, %v717_v58  ;;  %v719_v6 = vmul.f32 %v2238_v20, %v314_v39  ;;  %1421 = vst [vmem:[%s2285_s23 + $0x2d0] sm:$0xff] %v1117_v8  ;;  %v323_v40 = vld [vmem:[%s2195_s19 + $0x350] sm:$0xff]  ;;  %v324_v58 = vld [vmem:[%s2195_s19 + $0x358] sm:$0xff] }
  0xb4   : > { %1422 = vst [vmem:[%s2285_s23 + $0x2d8] sm:$0xff] %v1118_v9  ;;  %1423 = vst [vmem:[%s2285_s23 + $0x2e0] sm:$0xff] %v1119_v19  ;;  %v1123_v37 = vadd.f32 %v2233_v17, %v718_v24  ;;  %v720_v41 = vmul.f32 %v2244_v22, %v315_v61  ;;  %v721_v45 = vmul.f32 %v2253_v27, %v316_v62  ;;  %v325_v61 = vld [vmem:[%s2195_s19 + $0x360] sm:$0xff]  ;;  %v326_v19 = vld [vmem:[%s2195_s19 + $0x368] sm:$0xff] }
  0xb5   : > { %v722_v46 = vmul.f32 %v2262_v32, %v317_v7  ;;  %1424 = vst [vmem:[%s2285_s23 + $0x2e8] sm:$0xff] %v1120_v5  ;;  %1425 = vst [vmem:[%s2285_s23 + $0x2f0] sm:$0xff] %v1121_v31  ;;  %v1124_v11 = vadd.f32 %v2241_v21, %v719_v6  ;;  %v723_v39 = vmul.f32 %v2272_v38, %v318_v25  ;;  %v327_v24 = vld [vmem:[%s2195_s19 + $0x370] sm:$0xff]  ;;  %v328_v25 = vld [vmem:[%s2195_s19 + $0x378] sm:$0xff] }
  0xb6   : > { %1426 = vst [vmem:[%s2285_s23 + $0x2f8] sm:$0xff] %v1122_v36  ;;  %v724_v52 = vmul.f32 %v2292_v48, %v319_v3  ;;  %v725_v12 = vmul.f32 %v2303_v53, %v320_v30  ;;  %1427 = vst [vmem:[%s2285_s23 + $0x300] sm:$0xff] %v1123_v37  ;;  %v1125_v62 = vadd.f32 %v2247_v23, %v720_v41  ;;  %v329_v36 = vld [vmem:[%s2195_s19 + $0x380] sm:$0xff] }
  0xb7   : > { %v1126_v7 = vadd.f32 %v2256_v28, %v721_v45  ;;  %v1127_v8 = vadd.f32 %v2265_v33, %v722_v46  ;;  %v726_v9 = vmul.f32 %v2310_v55, %v321_v4  ;;  %1428 = vst [vmem:[%s2285_s23 + $0x308] sm:$0xff] %v1124_v11  ;;  %v1128_v3 = vadd.f32 %v2280_v44, %v723_v39  ;;  %v330_v45 = vld [vmem:[%s2195_s19 + $0x388] sm:$0xff] }
  0xb8   : > { %v1129_v30 = vadd.f32 %v2295_v49, %v724_v52  ;;  %v1130_v5 = vadd.f32 %v2307_v54, %v725_v12  ;;  %v727_v31 = vmul.f32 %v2321_v60, %v322_v47  ;;  %1429 = vst [vmem:[%s2285_s23 + $0x310] sm:$0xff] %v1125_v62  ;;  %v728_v4 = vmul.f32 %v2332_v1, %v323_v40  ;;  %v331_v52 = vld [vmem:[%s2195_s19 + $0x390] sm:$0xff]  ;;  %v332_v12 = vld [vmem:[%s2195_s19 + $0x398] sm:$0xff]  ;;  %v333_v40 = vld [vmem:[%s2195_s19 + $0x3a0] sm:$0xff] }
  0xb9   : > { %1430 = vst [vmem:[%s2285_s23 + $0x318] sm:$0xff] %v1126_v7  ;;  %1431 = vst [vmem:[%s2285_s23 + $0x320] sm:$0xff] %v1127_v8  ;;  %v1131_v6 = vadd.f32 %v2318_v59, %v726_v9  ;;  %v729_v37 = vmul.f32 %v2343_v18, %v324_v58  ;;  %v730_v41 = vmul.f32 %v2357_v34, %v325_v61  ;;  %v334_v8 = vld [vmem:[%s2195_s19 + $0x3a8] sm:$0xff]  ;;  %v335_v9 = vld [vmem:[%s2195_s19 + $0x3b0] sm:$0xff] }
  0xba   : > { %1432 = vst [vmem:[%s2285_s23 + $0x328] sm:$0xff] %v1128_v3  ;;  %1433 = vst [vmem:[%s2285_s23 + $0x330] sm:$0xff] %v1129_v30  ;;  %v1132_v46 = vadd.f32 %v2329_v0, %v727_v31  ;;  %v731_v47 = vmul.f32 %v2369_v42, %v326_v19  ;;  %v732_v11 = vmul.f32 %v2376_v10, %v327_v24  ;;  %v336_v19 = vld [vmem:[%s2195_s19 + $0x3b8] sm:$0xff] }
  0xbb   : > { %1434 = vst [vmem:[%s2285_s23 + $0x338] sm:$0xff] %v1130_v5  ;;  %v733_v39 = vmul.f32 %v2387_v51, %v328_v25  ;;  %1435 = vst [vmem:[%s2285_s23 + $0x340] sm:$0xff] %v1131_v6  ;;  %v1133_v58 = vadd.f32 %v2340_v15, %v728_v4  ;;  %v1134_v61 = vadd.f32 %v2350_v26, %v729_v37  ;;  %v337_v5 = vld [vmem:[%s2195_s19 + $0x3c0] sm:$0xff]  ;;  %v338_v37 = vld [vmem:[%s2195_s19 + $0x3c8] sm:$0xff] }
  0xbc   : > { %v1135_v62 = vadd.f32 %v2361_v35, %v730_v41  ;;  %v734_v7 = vmul.f32 %v2397_v57, %v329_v36  ;;  %1436 = vst [vmem:[%s2285_s23 + $0x348] sm:$0xff] %v1132_v46  ;;  %v1136_v24 = vadd.f32 %v2373_v43, %v731_v47  ;;  %v1137_v25 = vadd.f32 %v2384_v50, %v732_v11  ;;  %v339_v11 = vld [vmem:[%s2195_s19 + $0x3d0] sm:$0xff] }
  0xbd   : > { %v1138_v3 = vadd.f32 %v2394_v56, %v733_v39  ;;  %v735_v30 = vmul.f32 %v2409_v2, %v330_v45  ;;  %1437 = vst [vmem:[%s2285_s23 + $0x350] sm:$0xff] %v1133_v58  ;;  %1438 = vst [vmem:[%s2285_s23 + $0x358] sm:$0xff] %v1134_v61  ;;  %v736_v36 = vmul.f32 %v2223_v13, %v331_v52  ;;  %v340_v39 = vld [vmem:[%s2195_s19 + $0x3d8] sm:$0xff]  ;;  %v341_v52 = vld [vmem:[%s2195_s19 + $0x3e0] sm:$0xff] }
  0xbe   : > { %1439 = vst [vmem:[%s2285_s23 + $0x360] sm:$0xff] %v1135_v62  ;;  %v1139_v31 = vadd.f32 %v2406_v63, %v734_v7  ;;  %v737_v6 = vmul.f32 %v2230_v16, %v332_v12  ;;  %v738_v4 = vmul.f32 %v2238_v20, %v333_v40  ;;  %1440 = vst [vmem:[%s2285_s23 + $0x368] sm:$0xff] %v1136_v24  ;;  %v342_v62 = vld [vmem:[%s2195_s19 + $0x3e8] sm:$0xff]  ;;  %v343_v7 = vld [vmem:[%s2195_s19 + $0x3f0] sm:$0xff] }
  0xbf   : > { %1441 = vst [vmem:[%s2285_s23 + $0x370] sm:$0xff] %v1137_v25  ;;  %1442 = vst [vmem:[%s2285_s23 + $0x378] sm:$0xff] %v1138_v3  ;;  %v1140_v41 = vadd.f32 %v2418_v29, %v735_v30  ;;  %v739_v45 = vmul.f32 %v2244_v22, %v334_v8  ;;  %v740_v46 = vmul.f32 %v2253_v27, %v335_v9  ;;  %v344_v8 = vld [vmem:[%s2195_s19 + $0x3f8] sm:$0xff]  ;;  %v345_v3 = vld [vmem:[%s2195_s19 + $0x400] sm:$0xff] }
  0xc0   : > { %v741_v47 = vmul.f32 %v2262_v32, %v336_v19  ;;  %1443 = vst [vmem:[%s2285_s23 + $0x380] sm:$0xff] %v1139_v31  ;;  %v1141_v12 = vadd.f32 %v2226_v14, %v736_v36  ;;  %v1142_v40 = vadd.f32 %v2233_v17, %v737_v6  ;;  %v1143_v58 = vadd.f32 %v2241_v21, %v738_v4  ;;  %v346_v6 = vld [vmem:[%s2195_s19 + $0x408] sm:$0xff] }
  0xc1   : > { %v742_v61 = vmul.f32 %v2272_v38, %v337_v5  ;;  %1444 = vst [vmem:[%s2285_s23 + $0x388] sm:$0xff] %v1140_v41  ;;  %v1144_v9 = vadd.f32 %v2247_v23, %v739_v45  ;;  %v1145_v19 = vadd.f32 %v2256_v28, %v740_v46  ;;  %v743_v25 = vmul.f32 %v2292_v48, %v338_v37  ;;  %v347_v46 = vld [vmem:[%s2195_s19 + $0x410] sm:$0xff] }
  0xc2   : > { %v1146_v24 = vadd.f32 %v2265_v33, %v741_v47  ;;  %1445 = vst [vmem:[%s2285_s23 + $0x390] sm:$0xff] %v1141_v12  ;;  %1446 = vst [vmem:[%s2285_s23 + $0x398] sm:$0xff] %v1142_v40  ;;  %v744_v5 = vmul.f32 %v2303_v53, %v339_v11  ;;  %v745_v31 = vmul.f32 %v2310_v55, %v340_v39  ;;  %v348_v47 = vld [vmem:[%s2195_s19 + $0x418] sm:$0xff]  ;;  %v349_v11 = vld [vmem:[%s2195_s19 + $0x420] sm:$0xff] }
  0xc3   : > { %1447 = vst [vmem:[%s2285_s23 + $0x3a0] sm:$0xff] %v1143_v58  ;;  %v1147_v30 = vadd.f32 %v2280_v44, %v742_v61  ;;  %v746_v36 = vmul.f32 %v2321_v60, %v341_v52  ;;  %1448 = vst [vmem:[%s2285_s23 + $0x3a8] sm:$0xff] %v1144_v9  ;;  %v1148_v4 = vadd.f32 %v2295_v49, %v743_v25  ;;  %v350_v58 = vld [vmem:[%s2195_s19 + $0x428] sm:$0xff]  ;;  %v351_v61 = vld [vmem:[%s2195_s19 + $0x430] sm:$0xff] }
  0xc4   : > { %1449 = vst [vmem:[%s2285_s23 + $0x3b0] sm:$0xff] %v1145_v19  ;;  %1450 = vst [vmem:[%s2285_s23 + $0x3b8] sm:$0xff] %v1146_v24  ;;  %v747_v37 = vmul.f32 %v2332_v1, %v342_v62  ;;  %v748_v41 = vmul.f32 %v2343_v18, %v343_v7  ;;  %v749_v45 = vmul.f32 %v2357_v34, %v344_v8  ;;  %v352_v62 = vld [vmem:[%s2195_s19 + $0x438] sm:$0xff]  ;;  %v353_v24 = vld [vmem:[%s2195_s19 + $0x440] sm:$0xff] }
  0xc5   : > { %1451 = vst [vmem:[%s2285_s23 + $0x3c0] sm:$0xff] %v1147_v30  ;;  %v1149_v39 = vadd.f32 %v2307_v54, %v744_v5  ;;  %v1150_v52 = vadd.f32 %v2318_v59, %v745_v31  ;;  %v1151_v12 = vadd.f32 %v2329_v0, %v746_v36  ;;  %v750_v40 = vmul.f32 %v2369_v42, %v345_v3  ;;  %v354_v31 = vld [vmem:[%s2195_s19 + $0x448] sm:$0xff] }
  0xc6   : > { %1452 = vst [vmem:[%s2285_s23 + $0x3c8] sm:$0xff] %v1148_v4  ;;  %v1152_v7 = vadd.f32 %v2340_v15, %v747_v37  ;;  %v1153_v8 = vadd.f32 %v2350_v26, %v748_v41  ;;  %v1154_v9 = vadd.f32 %v2361_v35, %v749_v45  ;;  %v751_v19 = vmul.f32 %v2376_v10, %v346_v6  ;;  %v355_v41 = vld [vmem:[%s2195_s19 + $0x450] sm:$0xff]  ;;  %v356_v45 = vld [vmem:[%s2195_s19 + $0x458] sm:$0xff] }
  0xc7   : > { %1453 = vst [vmem:[%s2285_s23 + $0x3d0] sm:$0xff] %v1149_v39  ;;  %1454 = vst [vmem:[%s2285_s23 + $0x3d8] sm:$0xff] %v1150_v52  ;;  %v1155_v25 = vadd.f32 %v2373_v43, %v750_v40  ;;  %v752_v3 = vmul.f32 %v2387_v51, %v347_v46  ;;  %v753_v30 = vmul.f32 %v2397_v57, %v348_v47  ;;  %v357_v46 = vld [vmem:[%s2195_s19 + $0x460] sm:$0xff]  ;;  %v359_v40 = vld [vmem:[%s2195_s19 + $0x470] sm:$0xff] }
  0xc8   : > { %1455 = vst [vmem:[%s2285_s23 + $0x3e0] sm:$0xff] %v1151_v12  ;;  %v754_v5 = vmul.f32 %v2409_v2, %v349_v11  ;;  %1456 = vst [vmem:[%s2285_s23 + $0x3e8] sm:$0xff] %v1152_v7  ;;  %v1156_v36 = vadd.f32 %v2384_v50, %v751_v19  ;;  %v755_v6 = vmul.f32 %v2223_v13, %v350_v58  ;;  %v358_v12 = vld [vmem:[%s2195_s19 + $0x468] sm:$0xff]  ;;  %v360_v58 = vld [vmem:[%s2195_s19 + $0x478] sm:$0xff] }
  0xc9   : > { %1457 = vst [vmem:[%s2285_s23 + $0x3f0] sm:$0xff] %v1153_v8  ;;  %1458 = vst [vmem:[%s2285_s23 + $0x3f8] sm:$0xff] %v1154_v9  ;;  %v756_v4 = vmul.f32 %v2230_v16, %v351_v61  ;;  %v757_v37 = vmul.f32 %v2238_v20, %v352_v62  ;;  %v1157_v47 = vadd.f32 %v2394_v56, %v752_v3  ;;  %v361_v9 = vld [vmem:[%s2195_s19 + $0x480] sm:$0xff] }
  0xca   : > { %1459 = vst [vmem:[%s2285_s23 + $0x400] sm:$0xff] %v1155_v25  ;;  %v1158_v11 = vadd.f32 %v2406_v63, %v753_v30  ;;  %v1159_v39 = vadd.f32 %v2418_v29, %v754_v5  ;;  %v758_v52 = vmul.f32 %v2244_v22, %v353_v24  ;;  %1460 = vst [vmem:[%s2285_s23 + $0x408] sm:$0xff] %v1156_v36  ;;  %v362_v30 = vld [vmem:[%s2195_s19 + $0x488] sm:$0xff] }
  0xcb   : > { %v1160_v61 = vadd.f32 %v2226_v14, %v755_v6  ;;  %v1161_v62 = vadd.f32 %v2233_v17, %v756_v4  ;;  %v1162_v7 = vadd.f32 %v2241_v21, %v757_v37  ;;  %v759_v8 = vmul.f32 %v2253_v27, %v354_v31  ;;  %1461 = vst [vmem:[%s2285_s23 + $0x410] sm:$0xff] %v1157_v47  ;;  %v363_v4 = vld [vmem:[%s2195_s19 + $0x490] sm:$0xff]  ;;  %v364_v37 = vld [vmem:[%s2195_s19 + $0x498] sm:$0xff] }
  0xcc   : > { %1462 = vst [vmem:[%s2285_s23 + $0x418] sm:$0xff] %v1158_v11  ;;  %1463 = vst [vmem:[%s2285_s23 + $0x420] sm:$0xff] %v1159_v39  ;;  %v1163_v19 = vadd.f32 %v2247_v23, %v758_v52  ;;  %v760_v24 = vmul.f32 %v2262_v32, %v355_v41  ;;  %v761_v25 = vmul.f32 %v2272_v38, %v356_v45  ;;  %v365_v41 = vld [vmem:[%s2195_s19 + $0x4a0] sm:$0xff]  ;;  %v366_v39 = vld [vmem:[%s2195_s19 + $0x4a8] sm:$0xff] }
  0xcd   : > { %v762_v3 = vmul.f32 %v2292_v48, %v357_v46  ;;  %1464 = vst [vmem:[%s2285_s23 + $0x428] sm:$0xff] %v1160_v61  ;;  %1465 = vst [vmem:[%s2285_s23 + $0x430] sm:$0xff] %v1161_v62  ;;  %v1164_v5 = vadd.f32 %v2256_v28, %v759_v8  ;;  %v763_v31 = vmul.f32 %v2303_v53, %v358_v12  ;;  %v367_v52 = vld [vmem:[%s2195_s19 + $0x4b0] sm:$0xff]  ;;  %v368_v12 = vld [vmem:[%s2195_s19 + $0x4b8] sm:$0xff] }
  0xce   : > { %1466 = vst [vmem:[%s2285_s23 + $0x438] sm:$0xff] %v1162_v7  ;;  %v764_v36 = vmul.f32 %v2310_v55, %v359_v40  ;;  %v765_v6 = vmul.f32 %v2321_v60, %v360_v58  ;;  %1467 = vst [vmem:[%s2285_s23 + $0x440] sm:$0xff] %v1163_v19  ;;  %v1165_v45 = vadd.f32 %v2265_v33, %v760_v24  ;;  %v369_v7 = vld [vmem:[%s2195_s19 + $0x4c0] sm:$0xff] }
  0xcf   : > { %v1166_v46 = vadd.f32 %v2280_v44, %v761_v25  ;;  %v1167_v47 = vadd.f32 %v2295_v49, %v762_v3  ;;  %v766_v11 = vmul.f32 %v2332_v1, %v361_v9  ;;  %1468 = vst [vmem:[%s2285_s23 + $0x448] sm:$0xff] %v1164_v5  ;;  %v1168_v40 = vadd.f32 %v2307_v54, %v763_v31  ;;  %v370_v25 = vld [vmem:[%s2195_s19 + $0x4c8] sm:$0xff] }
  0xd0   : > { %v1169_v58 = vadd.f32 %v2318_v59, %v764_v36  ;;  %v1170_v61 = vadd.f32 %v2329_v0, %v765_v6  ;;  %v767_v62 = vmul.f32 %v2343_v18, %v362_v30  ;;  %1469 = vst [vmem:[%s2285_s23 + $0x450] sm:$0xff] %v1165_v45  ;;  %v768_v9 = vmul.f32 %v2357_v34, %v363_v4  ;;  %v371_v36 = vld [vmem:[%s2195_s19 + $0x4d0] sm:$0xff]  ;;  %v372_v6 = vld [vmem:[%s2195_s19 + $0x4d8] sm:$0xff]  ;;  %v373_v4 = vld [vmem:[%s2195_s19 + $0x4e0] sm:$0xff] }
  0xd1   : > { %1470 = vst [vmem:[%s2285_s23 + $0x458] sm:$0xff] %v1166_v46  ;;  %1471 = vst [vmem:[%s2285_s23 + $0x460] sm:$0xff] %v1167_v47  ;;  %v1171_v8 = vadd.f32 %v2340_v15, %v766_v11  ;;  %v769_v19 = vmul.f32 %v2369_v42, %v364_v37  ;;  %v770_v24 = vmul.f32 %v2376_v10, %v365_v41  ;;  %v374_v47 = vld [vmem:[%s2195_s19 + $0x4e8] sm:$0xff]  ;;  %v375_v11 = vld [vmem:[%s2195_s19 + $0x4f0] sm:$0xff] }
  0xd2   : > { %1472 = vst [vmem:[%s2285_s23 + $0x468] sm:$0xff] %v1168_v40  ;;  %1473 = vst [vmem:[%s2285_s23 + $0x470] sm:$0xff] %v1169_v58  ;;  %v1172_v3 = vadd.f32 %v2350_v26, %v767_v62  ;;  %v771_v30 = vmul.f32 %v2387_v51, %v366_v39  ;;  %v772_v5 = vmul.f32 %v2397_v57, %v367_v52  ;;  %v376_v39 = vld [vmem:[%s2195_s19 + $0x4f8] sm:$0xff] }
  0xd3   : > { %1474 = vst [vmem:[%s2285_s23 + $0x478] sm:$0xff] %v1170_v61  ;;  %v773_v31 = vmul.f32 %v2409_v2, %v368_v12  ;;  %1475 = vst [vmem:[%s2285_s23 + $0x480] sm:$0xff] %v1171_v8  ;;  %v1173_v37 = vadd.f32 %v2361_v35, %v768_v9  ;;  %v1174_v41 = vadd.f32 %v2373_v43, %v769_v19  ;;  %v377_v61 = vld [vmem:[%s2195_s19 + $0x500] sm:$0xff]  ;;  %v378_v19 = vld [vmem:[%s2195_s19 + $0x508] sm:$0xff] }
  0xd4   : > { %v1175_v45 = vadd.f32 %v2384_v50, %v770_v24  ;;  %v774_v46 = vmul.f32 %v2223_v13, %v369_v7  ;;  %1476 = vst [vmem:[%s2285_s23 + $0x488] sm:$0xff] %v1172_v3  ;;  %v1176_v52 = vadd.f32 %v2394_v56, %v771_v30  ;;  %v1177_v12 = vadd.f32 %v2406_v63, %v772_v5  ;;  %v379_v5 = vld [vmem:[%s2195_s19 + $0x510] sm:$0xff] }
  0xd5   : > { %v1178_v40 = vadd.f32 %v2418_v29, %v773_v31  ;;  %v775_v58 = vmul.f32 %v2230_v16, %v370_v25  ;;  %1477 = vst [vmem:[%s2285_s23 + $0x490] sm:$0xff] %v1173_v37  ;;  %1478 = vst [vmem:[%s2285_s23 + $0x498] sm:$0xff] %v1174_v41  ;;  %v776_v7 = vmul.f32 %v2238_v20, %v371_v36  ;;  %v380_v31 = vld [vmem:[%s2195_s19 + $0x518] sm:$0xff]  ;;  %v381_v36 = vld [vmem:[%s2195_s19 + $0x520] sm:$0xff] }
  0xd6   : > { %1479 = vst [vmem:[%s2285_s23 + $0x4a0] sm:$0xff] %v1175_v45  ;;  %v1179_v62 = vadd.f32 %v2226_v14, %v774_v46  ;;  %v777_v8 = vmul.f32 %v2244_v22, %v372_v6  ;;  %v778_v9 = vmul.f32 %v2253_v27, %v373_v4  ;;  %1480 = vst [vmem:[%s2285_s23 + $0x4a8] sm:$0xff] %v1176_v52  ;;  %v382_v45 = vld [vmem:[%s2195_s19 + $0x528] sm:$0xff]  ;;  %v383_v46 = vld [vmem:[%s2195_s19 + $0x530] sm:$0xff] }
  0xd7   : > { %1481 = vst [vmem:[%s2285_s23 + $0x4b0] sm:$0xff] %v1177_v12  ;;  %1482 = vst [vmem:[%s2285_s23 + $0x4b8] sm:$0xff] %v1178_v40  ;;  %v1180_v24 = vadd.f32 %v2233_v17, %v775_v58  ;;  %v779_v25 = vmul.f32 %v2262_v32, %v374_v47  ;;  %v780_v3 = vmul.f32 %v2272_v38, %v375_v11  ;;  %v384_v47 = vld [vmem:[%s2195_s19 + $0x538] sm:$0xff]  ;;  %v385_v40 = vld [vmem:[%s2195_s19 + $0x540] sm:$0xff] }
  0xd8   : > { %v781_v30 = vmul.f32 %v2292_v48, %v376_v39  ;;  %1483 = vst [vmem:[%s2285_s23 + $0x4c0] sm:$0xff] %v1179_v62  ;;  %v1181_v6 = vadd.f32 %v2241_v21, %v776_v7  ;;  %v1182_v4 = vadd.f32 %v2247_v23, %v777_v8  ;;  %v1183_v37 = vadd.f32 %v2256_v28, %v778_v9  ;;  %v386_v8 = vld [vmem:[%s2195_s19 + $0x548] sm:$0xff] }
  0xd9   : > { %v782_v41 = vmul.f32 %v2303_v53, %v377_v61  ;;  %1484 = vst [vmem:[%s2285_s23 + $0x4c8] sm:$0xff] %v1180_v24  ;;  %v1184_v11 = vadd.f32 %v2265_v33, %v779_v25  ;;  %v1185_v39 = vadd.f32 %v2280_v44, %v780_v3  ;;  %v783_v12 = vmul.f32 %v2310_v55, %v378_v19  ;;  %v387_v3 = vld [vmem:[%s2195_s19 + $0x550] sm:$0xff] }
  0xda   : > { %v1186_v52 = vadd.f32 %v2295_v49, %v781_v30  ;;  %1485 = vst [vmem:[%s2285_s23 + $0x4d0] sm:$0xff] %v1181_v6  ;;  %1486 = vst [vmem:[%s2285_s23 + $0x4d8] sm:$0xff] %v1182_v4  ;;  %v784_v61 = vmul.f32 %v2321_v60, %v379_v5  ;;  %v785_v62 = vmul.f32 %v2332_v1, %v380_v31  ;;  %v388_v30 = vld [vmem:[%s2195_s19 + $0x558] sm:$0xff]  ;;  %v389_v5 = vld [vmem:[%s2195_s19 + $0x560] sm:$0xff] }
  0xdb   : > { %1487 = vst [vmem:[%s2285_s23 + $0x4e0] sm:$0xff] %v1183_v37  ;;  %v1187_v58 = vadd.f32 %v2307_v54, %v782_v41  ;;  %v786_v7 = vmul.f32 %v2343_v18, %v381_v36  ;;  %1488 = vst [vmem:[%s2285_s23 + $0x4e8] sm:$0xff] %v1184_v11  ;;  %v1188_v9 = vadd.f32 %v2318_v59, %v783_v12  ;;  %v390_v37 = vld [vmem:[%s2195_s19 + $0x568] sm:$0xff]  ;;  %v391_v41 = vld [vmem:[%s2195_s19 + $0x570] sm:$0xff] }
  0xdc   : > { %1489 = vst [vmem:[%s2285_s23 + $0x4f0] sm:$0xff] %v1185_v39  ;;  %1490 = vst [vmem:[%s2285_s23 + $0x4f8] sm:$0xff] %v1186_v52  ;;  %v787_v19 = vmul.f32 %v2357_v34, %v382_v45  ;;  %v788_v24 = vmul.f32 %v2369_v42, %v383_v46  ;;  %v789_v25 = vmul.f32 %v2376_v10, %v384_v47  ;;  %v392_v45 = vld [vmem:[%s2195_s19 + $0x578] sm:$0xff]  ;;  %v393_v52 = vld [vmem:[%s2195_s19 + $0x580] sm:$0xff] }
  0xdd   : > { %1491 = vst [vmem:[%s2285_s23 + $0x500] sm:$0xff] %v1187_v58  ;;  %v1189_v31 = vadd.f32 %v2329_v0, %v784_v61  ;;  %v1190_v36 = vadd.f32 %v2340_v15, %v785_v62  ;;  %v1191_v6 = vadd.f32 %v2350_v26, %v786_v7  ;;  %v790_v4 = vmul.f32 %v2387_v51, %v385_v40  ;;  %v394_v62 = vld [vmem:[%s2195_s19 + $0x588] sm:$0xff] }
  0xde   : > { %1492 = vst [vmem:[%s2285_s23 + $0x508] sm:$0xff] %v1188_v9  ;;  %v1192_v46 = vadd.f32 %v2361_v35, %v787_v19  ;;  %v1193_v47 = vadd.f32 %v2373_v43, %v788_v24  ;;  %v1194_v11 = vadd.f32 %v2384_v50, %v789_v25  ;;  %v791_v39 = vmul.f32 %v2397_v57, %v386_v8  ;;  %v395_v24 = vld [vmem:[%s2195_s19 + $0x590] sm:$0xff]  ;;  %v396_v25 = vld [vmem:[%s2195_s19 + $0x598] sm:$0xff] }
  0xdf   : > { %1493 = vst [vmem:[%s2285_s23 + $0x510] sm:$0xff] %v1189_v31  ;;  %1494 = vst [vmem:[%s2285_s23 + $0x518] sm:$0xff] %v1190_v36  ;;  %v1195_v12 = vadd.f32 %v2394_v56, %v790_v4  ;;  %v792_v40 = vmul.f32 %v2409_v2, %v387_v3  ;;  %v793_v58 = vmul.f32 %v2223_v13, %v388_v30  ;;  %v397_v3 = vld [vmem:[%s2195_s19 + $0x5a0] sm:$0xff]  ;;  %v399_v4 = vld [vmem:[%s2195_s19 + $0x5b0] sm:$0xff] }
  0xe0   : > { %1495 = vst [vmem:[%s2285_s23 + $0x520] sm:$0xff] %v1191_v6  ;;  %v794_v61 = vmul.f32 %v2230_v16, %v389_v5  ;;  %1496 = vst [vmem:[%s2285_s23 + $0x528] sm:$0xff] %v1192_v46  ;;  %v1196_v7 = vadd.f32 %v2406_v63, %v791_v39  ;;  %v795_v8 = vmul.f32 %v2238_v20, %v390_v37  ;;  %v398_v6 = vld [vmem:[%s2195_s19 + $0x5a8] sm:$0xff]  ;;  %v400_v37 = vld [vmem:[%s2195_s19 + $0x5b8] sm:$0xff] }
  0xe1   : > { %1497 = vst [vmem:[%s2285_s23 + $0x530] sm:$0xff] %v1193_v47  ;;  %1498 = vst [vmem:[%s2285_s23 + $0x538] sm:$0xff] %v1194_v11  ;;  %v796_v9 = vmul.f32 %v2244_v22, %v391_v41  ;;  %v797_v19 = vmul.f32 %v2253_v27, %v392_v45  ;;  %v1197_v30 = vadd.f32 %v2418_v29, %v792_v40  ;;  %v401_v11 = vld [vmem:[%s2195_s19 + $0x5c0] sm:$0xff] }
  0xe2   : > { %1499 = vst [vmem:[%s2285_s23 + $0x540] sm:$0xff] %v1195_v12  ;;  %v1198_v5 = vadd.f32 %v2226_v14, %v793_v58  ;;  %v1199_v31 = vadd.f32 %v2233_v17, %v794_v61  ;;  %v798_v36 = vmul.f32 %v2262_v32, %v393_v52  ;;  %1500 = vst [vmem:[%s2285_s23 + $0x548] sm:$0xff] %v1196_v7  ;;  %v402_v58 = vld [vmem:[%s2195_s19 + $0x5c8] sm:$0xff] }
  0xe3   : > { %v1200_v41 = vadd.f32 %v2241_v21, %v795_v8  ;;  %v1201_v45 = vadd.f32 %v2247_v23, %v796_v9  ;;  %v1202_v46 = vadd.f32 %v2256_v28, %v797_v19  ;;  %v799_v47 = vmul.f32 %v2272_v38, %v394_v62  ;;  %1501 = vst [vmem:[%s2285_s23 + $0x550] sm:$0xff] %v1197_v30  ;;  %v403_v9 = vld [vmem:[%s2195_s19 + $0x5d0] sm:$0xff]  ;;  %v404_v19 = vld [vmem:[%s2195_s19 + $0x5d8] sm:$0xff] }
  0xe4   : > { %1502 = vst [vmem:[%s2285_s23 + $0x558] sm:$0xff] %v1198_v5  ;;  %1503 = vst [vmem:[%s2285_s23 + $0x560] sm:$0xff] %v1199_v31  ;;  %v1203_v39 = vadd.f32 %v2265_v33, %v798_v36  ;;  %v800_v52 = vmul.f32 %v2292_v48, %v395_v24  ;;  %v801_v12 = vmul.f32 %v2303_v53, %v396_v25  ;;  %v405_v24 = vld [vmem:[%s2195_s19 + $0x5e0] sm:$0xff]  ;;  %v406_v31 = vld [vmem:[%s2195_s19 + $0x5e8] sm:$0xff] }
  0xe5   : > { %v802_v40 = vmul.f32 %v2310_v55, %v397_v3  ;;  %1504 = vst [vmem:[%s2285_s23 + $0x568] sm:$0xff] %v1200_v41  ;;  %1505 = vst [vmem:[%s2285_s23 + $0x570] sm:$0xff] %v1201_v45  ;;  %v1204_v61 = vadd.f32 %v2280_v44, %v799_v47  ;;  %v803_v62 = vmul.f32 %v2321_v60, %v398_v6  ;;  %v407_v36 = vld [vmem:[%s2195_s19 + $0x5f0] sm:$0xff]  ;;  %v408_v6 = vld [vmem:[%s2195_s19 + $0x5f8] sm:$0xff] }
  0xe6   : > { %1506 = vst [vmem:[%s2285_s23 + $0x578] sm:$0xff] %v1202_v46  ;;  %v804_v7 = vmul.f32 %v2332_v1, %v399_v4  ;;  %v805_v8 = vmul.f32 %v2343_v18, %v400_v37  ;;  %1507 = vst [vmem:[%s2285_s23 + $0x580] sm:$0xff] %v1203_v39  ;;  %v1205_v25 = vadd.f32 %v2295_v49, %v800_v52  ;;  %v409_v46 = vld [vmem:[%s2195_s19 + $0x600] sm:$0xff] }
  0xe7   : > { %v1206_v3 = vadd.f32 %v2307_v54, %v801_v12  ;;  %v1207_v30 = vadd.f32 %v2318_v59, %v802_v40  ;;  %v806_v5 = vmul.f32 %v2357_v34, %v401_v11  ;;  %1508 = vst [vmem:[%s2285_s23 + $0x588] sm:$0xff] %v1204_v61  ;;  %v1208_v4 = vadd.f32 %v2329_v0, %v803_v62  ;;  %v410_v12 = vld [vmem:[%s2195_s19 + $0x608] sm:$0xff] }
  0xe8   : > { %v1209_v37 = vadd.f32 %v2340_v15, %v804_v7  ;;  %v1210_v41 = vadd.f32 %v2350_v26, %v805_v8  ;;  %v807_v45 = vmul.f32 %v2369_v42, %v402_v58  ;;  %1509 = vst [vmem:[%s2285_s23 + $0x590] sm:$0xff] %v1205_v25  ;;  %v808_v11 = vmul.f32 %v2376_v10, %v403_v9  ;;  %v411_v7 = vld [vmem:[%s2195_s19 + $0x610] sm:$0xff]  ;;  %v412_v8 = vld [vmem:[%s2195_s19 + $0x618] sm:$0xff]  ;;  %v413_v9 = vld [vmem:[%s2195_s19 + $0x620] sm:$0xff] }
  0xe9   : > { %1510 = vst [vmem:[%s2285_s23 + $0x598] sm:$0xff] %v1206_v3  ;;  %1511 = vst [vmem:[%s2285_s23 + $0x5a0] sm:$0xff] %v1207_v30  ;;  %v1211_v47 = vadd.f32 %v2361_v35, %v806_v5  ;;  %v809_v39 = vmul.f32 %v2387_v51, %v404_v19  ;;  %v810_v52 = vmul.f32 %v2397_v57, %v405_v24  ;;  %v414_v30 = vld [vmem:[%s2195_s19 + $0x628] sm:$0xff]  ;;  %v415_v5 = vld [vmem:[%s2195_s19 + $0x630] sm:$0xff] }
  0xea   : > { %1512 = vst [vmem:[%s2285_s23 + $0x5a8] sm:$0xff] %v1208_v4  ;;  %1513 = vst [vmem:[%s2285_s23 + $0x5b0] sm:$0xff] %v1209_v37  ;;  %v1212_v40 = vadd.f32 %v2373_v43, %v807_v45  ;;  %v811_v58 = vmul.f32 %v2409_v2, %v406_v31  ;;  %v812_v61 = vmul.f32 %v2223_v13, %v407_v36  ;;  %v416_v31 = vld [vmem:[%s2195_s19 + $0x638] sm:$0xff] }
  0xeb   : > { %1514 = vst [vmem:[%s2285_s23 + $0x5b8] sm:$0xff] %v1210_v41  ;;  %v813_v62 = vmul.f32 %v2230_v16, %v408_v6  ;;  %1515 = vst [vmem:[%s2285_s23 + $0x5c0] sm:$0xff] %v1211_v47  ;;  %v1213_v19 = vadd.f32 %v2384_v50, %v808_v11  ;;  %v1214_v24 = vadd.f32 %v2394_v56, %v809_v39  ;;  %v417_v41 = vld [vmem:[%s2195_s19 + $0x640] sm:$0xff]  ;;  %v418_v39 = vld [vmem:[%s2195_s19 + $0x648] sm:$0xff] }
  0xec   : > { %v1215_v25 = vadd.f32 %v2406_v63, %v810_v52  ;;  %v814_v3 = vmul.f32 %v2238_v20, %v409_v46  ;;  %1516 = vst [vmem:[%s2285_s23 + $0x5c8] sm:$0xff] %v1212_v40  ;;  %v1216_v36 = vadd.f32 %v2418_v29, %v811_v58  ;;  %v1217_v6 = vadd.f32 %v2226_v14, %v812_v61  ;;  %v419_v61 = vld [vmem:[%s2195_s19 + $0x650] sm:$0xff] }
  0xed   : > { %v1218_v4 = vadd.f32 %v2233_v17, %v813_v62  ;;  %v815_v37 = vmul.f32 %v2244_v22, %v410_v12  ;;  %1517 = vst [vmem:[%s2285_s23 + $0x5d0] sm:$0xff] %v1213_v19  ;;  %1518 = vst [vmem:[%s2285_s23 + $0x5d8] sm:$0xff] %v1214_v24  ;;  %v816_v46 = vmul.f32 %v2253_v27, %v411_v7  ;;  %v420_v62 = vld [vmem:[%s2195_s19 + $0x658] sm:$0xff]  ;;  %v421_v7 = vld [vmem:[%s2195_s19 + $0x660] sm:$0xff] }
  0xee   : > { %1519 = vst [vmem:[%s2285_s23 + $0x5e0] sm:$0xff] %v1215_v25  ;;  %v1219_v45 = vadd.f32 %v2241_v21, %v814_v3  ;;  %v817_v47 = vmul.f32 %v2262_v32, %v412_v8  ;;  %v818_v11 = vmul.f32 %v2272_v38, %v413_v9  ;;  %1520 = vst [vmem:[%s2285_s23 + $0x5e8] sm:$0xff] %v1216_v36  ;;  %v422_v25 = vld [vmem:[%s2195_s19 + $0x668] sm:$0xff]  ;;  %v423_v3 = vld [vmem:[%s2195_s19 + $0x670] sm:$0xff] }
  0xef   : > { %1521 = vst [vmem:[%s2285_s23 + $0x5f0] sm:$0xff] %v1217_v6  ;;  %1522 = vst [vmem:[%s2285_s23 + $0x5f8] sm:$0xff] %v1218_v4  ;;  %v1220_v52 = vadd.f32 %v2247_v23, %v815_v37  ;;  %v819_v12 = vmul.f32 %v2292_v48, %v414_v30  ;;  %v820_v40 = vmul.f32 %v2303_v53, %v415_v5  ;;  %v424_v30 = vld [vmem:[%s2195_s19 + $0x678] sm:$0xff]  ;;  %v425_v4 = vld [vmem:[%s2195_s19 + $0x680] sm:$0xff] }
  0xf0   : > { %v821_v58 = vmul.f32 %v2310_v55, %v416_v31  ;;  %1523 = vst [vmem:[%s2285_s23 + $0x600] sm:$0xff] %v1219_v45  ;;  %v1221_v8 = vadd.f32 %v2256_v28, %v816_v46  ;;  %v1222_v9 = vadd.f32 %v2265_v33, %v817_v47  ;;  %v1223_v19 = vadd.f32 %v2280_v44, %v818_v11  ;;  %v426_v47 = vld [vmem:[%s2195_s19 + $0x688] sm:$0xff] }
  0xf1   : > { %v822_v24 = vmul.f32 %v2321_v60, %v417_v41  ;;  %1524 = vst [vmem:[%s2285_s23 + $0x608] sm:$0xff] %v1220_v52  ;;  %v1224_v5 = vadd.f32 %v2295_v49, %v819_v12  ;;  %v1225_v31 = vadd.f32 %v2307_v54, %v820_v40  ;;  %v823_v6 = vmul.f32 %v2332_v1, %v418_v39  ;;  %v427_v40 = vld [vmem:[%s2195_s19 + $0x690] sm:$0xff] }
  0xf2   : > { %v1226_v36 = vadd.f32 %v2318_v59, %v821_v58  ;;  %1525 = vst [vmem:[%s2285_s23 + $0x610] sm:$0xff] %v1221_v8  ;;  %1526 = vst [vmem:[%s2285_s23 + $0x618] sm:$0xff] %v1222_v9  ;;  %v824_v41 = vmul.f32 %v2343_v18, %v419_v61  ;;  %v825_v45 = vmul.f32 %v2357_v34, %v420_v62  ;;  %v428_v58 = vld [vmem:[%s2195_s19 + $0x698] sm:$0xff]  ;;  %v429_v61 = vld [vmem:[%s2195_s19 + $0x6a0] sm:$0xff] }
  0xf3   : > { %1527 = vst [vmem:[%s2285_s23 + $0x620] sm:$0xff] %v1223_v19  ;;  %v1227_v37 = vadd.f32 %v2329_v0, %v822_v24  ;;  %v826_v46 = vmul.f32 %v2369_v42, %v421_v7  ;;  %1528 = vst [vmem:[%s2285_s23 + $0x628] sm:$0xff] %v1224_v5  ;;  %v1228_v11 = vadd.f32 %v2340_v15, %v823_v6  ;;  %v430_v19 = vld [vmem:[%s2195_s19 + $0x6a8] sm:$0xff]  ;;  %v431_v24 = vld [vmem:[%s2195_s19 + $0x6b0] sm:$0xff] }
  0xf4   : > { %1529 = vst [vmem:[%s2285_s23 + $0x630] sm:$0xff] %v1225_v31  ;;  %1530 = vst [vmem:[%s2285_s23 + $0x638] sm:$0xff] %v1226_v36  ;;  %v827_v39 = vmul.f32 %v2376_v10, %v422_v25  ;;  %v828_v52 = vmul.f32 %v2387_v51, %v423_v3  ;;  %v829_v12 = vmul.f32 %v2397_v57, %v424_v30  ;;  %v432_v25 = vld [vmem:[%s2195_s19 + $0x6b8] sm:$0xff]  ;;  %v433_v36 = vld [vmem:[%s2195_s19 + $0x6c0] sm:$0xff] }
  0xf5   : > { %1531 = vst [vmem:[%s2285_s23 + $0x640] sm:$0xff] %v1227_v37  ;;  %v1229_v62 = vadd.f32 %v2350_v26, %v824_v41  ;;  %v1230_v7 = vadd.f32 %v2361_v35, %v825_v45  ;;  %v1231_v8 = vadd.f32 %v2373_v43, %v826_v46  ;;  %v830_v9 = vmul.f32 %v2409_v2, %v425_v4  ;;  %v434_v45 = vld [vmem:[%s2195_s19 + $0x6c8] sm:$0xff] }
  0xf6   : > { %1532 = vst [vmem:[%s2285_s23 + $0x648] sm:$0xff] %v1228_v11  ;;  %v1232_v3 = vadd.f32 %v2384_v50, %v827_v39  ;;  %v1233_v30 = vadd.f32 %v2394_v56, %v828_v52  ;;  %v1234_v5 = vadd.f32 %v2406_v63, %v829_v12  ;;  %v831_v31 = vmul.f32 %v2223_v13, %v426_v47  ;;  %v435_v52 = vld [vmem:[%s2195_s19 + $0x6d0] sm:$0xff]  ;;  %v436_v12 = vld [vmem:[%s2195_s19 + $0x6d8] sm:$0xff] }
  0xf7   : > { %1533 = vst [vmem:[%s2285_s23 + $0x650] sm:$0xff] %v1229_v62  ;;  %1534 = vst [vmem:[%s2285_s23 + $0x658] sm:$0xff] %v1230_v7  ;;  %v1235_v6 = vadd.f32 %v2418_v29, %v830_v9  ;;  %v832_v4 = vmul.f32 %v2230_v16, %v427_v40  ;;  %v833_v37 = vmul.f32 %v2238_v20, %v428_v58  ;;  %v437_v40 = vld [vmem:[%s2195_s19 + $0x6e0] sm:$0xff]  ;;  %v439_v9 = vld [vmem:[%s2195_s19 + $0x6f0] sm:$0xff] }
  0xf8   : > { %1535 = vst [vmem:[%s2285_s23 + $0x660] sm:$0xff] %v1231_v8  ;;  %v834_v41 = vmul.f32 %v2244_v22, %v429_v61  ;;  %1536 = vst [vmem:[%s2285_s23 + $0x668] sm:$0xff] %v1232_v3  ;;  %v1236_v46 = vadd.f32 %v2226_v14, %v831_v31  ;;  %v835_v47 = vmul.f32 %v2253_v27, %v430_v19  ;;  %v438_v8 = vld [vmem:[%s2195_s19 + $0x6e8] sm:$0xff]  ;;  %v440_v19 = vld [vmem:[%s2195_s19 + $0x6f8] sm:$0xff] }
  0xf9   : > { %1537 = vst [vmem:[%s2285_s23 + $0x670] sm:$0xff] %v1233_v30  ;;  %1538 = vst [vmem:[%s2285_s23 + $0x678] sm:$0xff] %v1234_v5  ;;  %v836_v11 = vmul.f32 %v2262_v32, %v431_v24  ;;  %v837_v39 = vmul.f32 %v2272_v38, %v432_v25  ;;  %v1237_v58 = vadd.f32 %v2233_v17, %v832_v4  ;;  %v441_v5 = vld [vmem:[%s2195_s19 + $0x700] sm:$0xff] }
  0xfa   : > { %1539 = vst [vmem:[%s2285_s23 + $0x680] sm:$0xff] %v1235_v6  ;;  %v1238_v61 = vadd.f32 %v2241_v21, %v833_v37  ;;  %v1239_v62 = vadd.f32 %v2247_v23, %v834_v41  ;;  %v838_v7 = vmul.f32 %v2292_v48, %v433_v36  ;;  %1540 = vst [vmem:[%s2285_s23 + $0x688] sm:$0xff] %v1236_v46  ;;  %v442_v37 = vld [vmem:[%s2195_s19 + $0x708] sm:$0xff] }
  0xfb   : > { %v1240_v24 = vadd.f32 %v2256_v28, %v835_v47  ;;  %v1241_v25 = vadd.f32 %v2265_v33, %v836_v11  ;;  %v1242_v3 = vadd.f32 %v2280_v44, %v837_v39  ;;  %v839_v30 = vmul.f32 %v2303_v53, %v434_v45  ;;  %1541 = vst [vmem:[%s2285_s23 + $0x690] sm:$0xff] %v1237_v58  ;;  %v443_v11 = vld [vmem:[%s2195_s19 + $0x710] sm:$0xff]  ;;  %v444_v39 = vld [vmem:[%s2195_s19 + $0x718] sm:$0xff] }
  0xfc   : > { %1542 = vst [vmem:[%s2285_s23 + $0x698] sm:$0xff] %v1238_v61  ;;  %1543 = vst [vmem:[%s2285_s23 + $0x6a0] sm:$0xff] %v1239_v62  ;;  %v1243_v31 = vadd.f32 %v2295_v49, %v838_v7  ;;  %v840_v36 = vmul.f32 %v2310_v55, %v435_v52  ;;  %v841_v6 = vmul.f32 %v2321_v60, %v436_v12  ;;  %v445_v52 = vld [vmem:[%s2195_s19 + $0x720] sm:$0xff]  ;;  %v446_v62 = vld [vmem:[%s2195_s19 + $0x728] sm:$0xff] }
  0xfd   : > { %v842_v4 = vmul.f32 %v2332_v1, %v437_v40  ;;  %1544 = vst [vmem:[%s2285_s23 + $0x6a8] sm:$0xff] %v1240_v24  ;;  %1545 = vst [vmem:[%s2285_s23 + $0x6b0] sm:$0xff] %v1241_v25  ;;  %v1244_v41 = vadd.f32 %v2307_v54, %v839_v30  ;;  %v843_v45 = vmul.f32 %v2343_v18, %v438_v8  ;;  %v447_v7 = vld [vmem:[%s2195_s19 + $0x730] sm:$0xff]  ;;  %v448_v8 = vld [vmem:[%s2195_s19 + $0x738] sm:$0xff] }
  0xfe   : > { %1546 = vst [vmem:[%s2285_s23 + $0x6b8] sm:$0xff] %v1242_v3  ;;  %v844_v46 = vmul.f32 %v2357_v34, %v439_v9  ;;  %v845_v47 = vmul.f32 %v2369_v42, %v440_v19  ;;  %1547 = vst [vmem:[%s2285_s23 + $0x6c0] sm:$0xff] %v1243_v31  ;;  %v1245_v12 = vadd.f32 %v2318_v59, %v840_v36  ;;  %v449_v3 = vld [vmem:[%s2195_s19 + $0x740] sm:$0xff] }
  0xff   : > { %v1246_v40 = vadd.f32 %v2329_v0, %v841_v6  ;;  %v1247_v58 = vadd.f32 %v2340_v15, %v842_v4  ;;  %v846_v61 = vmul.f32 %v2376_v10, %v441_v5  ;;  %1548 = vst [vmem:[%s2285_s23 + $0x6c8] sm:$0xff] %v1244_v41  ;;  %v1248_v9 = vadd.f32 %v2350_v26, %v843_v45  ;;  %v450_v6 = vld [vmem:[%s2195_s19 + $0x748] sm:$0xff] }
 0x100   : > { %v1249_v19 = vadd.f32 %v2361_v35, %v844_v46  ;;  %v1250_v24 = vadd.f32 %v2373_v43, %v845_v47  ;;  %v847_v25 = vmul.f32 %v2387_v51, %v442_v37  ;;  %1549 = vst [vmem:[%s2285_s23 + $0x6d0] sm:$0xff] %v1245_v12  ;;  %v848_v5 = vmul.f32 %v2397_v57, %v443_v11  ;;  %v451_v46 = vld [vmem:[%s2195_s19 + $0x750] sm:$0xff]  ;;  %v452_v47 = vld [vmem:[%s2195_s19 + $0x758] sm:$0xff]  ;;  %v453_v11 = vld [vmem:[%s2195_s19 + $0x760] sm:$0xff] }
 0x101   : > { %1550 = vst [vmem:[%s2285_s23 + $0x6d8] sm:$0xff] %v1246_v40  ;;  %1551 = vst [vmem:[%s2285_s23 + $0x6e0] sm:$0xff] %v1247_v58  ;;  %v1251_v30 = vadd.f32 %v2384_v50, %v846_v61  ;;  %v849_v31 = vmul.f32 %v2409_v2, %v444_v39  ;;  %v850_v36 = vmul.f32 %v2223_v13, %v445_v52  ;;  %v454_v58 = vld [vmem:[%s2195_s19 + $0x768] sm:$0xff]  ;;  %v455_v61 = vld [vmem:[%s2195_s19 + $0x770] sm:$0xff] }
 0x102   : > { %1552 = vst [vmem:[%s2285_s23 + $0x6e8] sm:$0xff] %v1248_v9  ;;  %1553 = vst [vmem:[%s2285_s23 + $0x6f0] sm:$0xff] %v1249_v19  ;;  %v1252_v4 = vadd.f32 %v2394_v56, %v847_v25  ;;  %v851_v37 = vmul.f32 %v2230_v16, %v446_v62  ;;  %v852_v41 = vmul.f32 %v2238_v20, %v447_v7  ;;  %v456_v62 = vld [vmem:[%s2195_s19 + $0x778] sm:$0xff] }
 0x103   : > { %1554 = vst [vmem:[%s2285_s23 + $0x6f8] sm:$0xff] %v1250_v24  ;;  %v853_v45 = vmul.f32 %v2244_v22, %v448_v8  ;;  %1555 = vst [vmem:[%s2285_s23 + $0x700] sm:$0xff] %v1251_v30  ;;  %v1253_v39 = vadd.f32 %v2406_v63, %v848_v5  ;;  %v1254_v52 = vadd.f32 %v2418_v29, %v849_v31  ;;  %v457_v24 = vld [vmem:[%s2195_s19 + $0x780] sm:$0xff]  ;;  %v458_v31 = vld [vmem:[%s2195_s19 + $0x788] sm:$0xff] }
 0x104   : > { %v1255_v12 = vadd.f32 %v2226_v14, %v850_v36  ;;  %v854_v40 = vmul.f32 %v2253_v27, %v449_v3  ;;  %1556 = vst [vmem:[%s2285_s23 + $0x708] sm:$0xff] %v1252_v4  ;;  %v1256_v7 = vadd.f32 %v2233_v17, %v851_v37  ;;  %v1257_v8 = vadd.f32 %v2241_v21, %v852_v41  ;;  %v459_v41 = vld [vmem:[%s2195_s19 + $0x790] sm:$0xff] }
 0x105   : > { %v1258_v9 = vadd.f32 %v2247_v23, %v853_v45  ;;  %v855_v19 = vmul.f32 %v2262_v32, %v450_v6  ;;  %1557 = vst [vmem:[%s2285_s23 + $0x710] sm:$0xff] %v1253_v39  ;;  %1558 = vst [vmem:[%s2285_s23 + $0x718] sm:$0xff] %v1254_v52  ;;  %v856_v3 = vmul.f32 %v2272_v38, %v451_v46  ;;  %v460_v45 = vld [vmem:[%s2195_s19 + $0x798] sm:$0xff]  ;;  %v461_v46 = vld [vmem:[%s2195_s19 + $0x7a0] sm:$0xff] }
 0x106   : > { %1559 = vst [vmem:[%s2285_s23 + $0x720] sm:$0xff] %v1255_v12  ;;  %v1259_v25 = vadd.f32 %v2256_v28, %v854_v40  ;;  %v857_v30 = vmul.f32 %v2292_v48, %v452_v47  ;;  %v858_v5 = vmul.f32 %v2303_v53, %v453_v11  ;;  %1560 = vst [vmem:[%s2285_s23 + $0x728] sm:$0xff] %v1256_v7  ;;  %v462_v12 = vld [vmem:[%s2195_s19 + $0x7a8] sm:$0xff]  ;;  %v463_v40 = vld [vmem:[%s2195_s19 + $0x7b0] sm:$0xff] }
 0x107   : > { %1561 = vst [vmem:[%s2285_s23 + $0x730] sm:$0xff] %v1257_v8  ;;  %1562 = vst [vmem:[%s2285_s23 + $0x738] sm:$0xff] %v1258_v9  ;;  %v1260_v36 = vadd.f32 %v2265_v33, %v855_v19  ;;  %v859_v6 = vmul.f32 %v2310_v55, %v454_v58  ;;  %v860_v4 = vmul.f32 %v2321_v60, %v455_v61  ;;  %v464_v58 = vld [vmem:[%s2195_s19 + $0x7b8] sm:$0xff]  ;;  %v465_v9 = vld [vmem:[%s2195_s19 + $0x7c0] sm:$0xff] }
 0x108   : > { %v861_v37 = vmul.f32 %v2332_v1, %v456_v62  ;;  %1563 = vst [vmem:[%s2285_s23 + $0x740] sm:$0xff] %v1259_v25  ;;  %v1261_v47 = vadd.f32 %v2280_v44, %v856_v3  ;;  %v1262_v11 = vadd.f32 %v2295_v49, %v857_v30  ;;  %v1263_v39 = vadd.f32 %v2307_v54, %v858_v5  ;;  %v466_v30 = vld [vmem:[%s2195_s19 + $0x7c8] sm:$0xff] }
 0x109   : > { %v862_v52 = vmul.f32 %v2343_v18, %v457_v24  ;;  %1564 = vst [vmem:[%s2285_s23 + $0x748] sm:$0xff] %v1260_v36  ;;  %v1264_v61 = vadd.f32 %v2318_v59, %v859_v6  ;;  %v1265_v62 = vadd.f32 %v2329_v0, %v860_v4  ;;  %v863_v8 = vmul.f32 %v2357_v34, %v458_v31  ;;  %v467_v4 = vld [vmem:[%s2195_s19 + $0x7d0] sm:$0xff] }
 0x10a   : > { %v1266_v7 = vadd.f32 %v2340_v15, %v861_v37  ;;  %1565 = vst [vmem:[%s2285_s23 + $0x750] sm:$0xff] %v1261_v47  ;;  %1566 = vst [vmem:[%s2285_s23 + $0x758] sm:$0xff] %v1262_v11  ;;  %v864_v24 = vmul.f32 %v2369_v42, %v459_v41  ;;  %v865_v25 = vmul.f32 %v2376_v10, %v460_v45  ;;  %v468_v37 = vld [vmem:[%s2195_s19 + $0x7d8] sm:$0xff]  ;;  %v469_v41 = vld [vmem:[%s2195_s19 + $0x7e0] sm:$0xff] }
 0x10b   : > { %1567 = vst [vmem:[%s2285_s23 + $0x760] sm:$0xff] %v1263_v39  ;;  %v1267_v19 = vadd.f32 %v2350_v26, %v862_v52  ;;  %v866_v3 = vmul.f32 %v2387_v51, %v461_v46  ;;  %1568 = vst [vmem:[%s2285_s23 + $0x768] sm:$0xff] %v1264_v61  ;;  %v1268_v5 = vadd.f32 %v2361_v35, %v863_v8  ;;  %v470_v39 = vld [vmem:[%s2195_s19 + $0x7e8] sm:$0xff]  ;;  %v471_v52 = vld [vmem:[%s2195_s19 + $0x7f0] sm:$0xff] }
 0x10c   : > { %1569 = vst [vmem:[%s2285_s23 + $0x770] sm:$0xff] %v1265_v62  ;;  %1570 = vst [vmem:[%s2285_s23 + $0x778] sm:$0xff] %v1266_v7  ;;  %v867_v31 = vmul.f32 %v2397_v57, %v462_v12  ;;  %v868_v36 = vmul.f32 %v2409_v2, %v463_v40  ;;  %v869_v6 = vmul.f32 %v2223_v13, %v464_v58  ;;  %v472_v12 = vld [vmem:[%s2195_s19 + $0x7f8] sm:$0xff]  ;;  %v473_v7 = vld [vmem:[%s2195_s19 + $0x800] sm:$0xff] }
 0x10d   : > { %1571 = vst [vmem:[%s2285_s23 + $0x780] sm:$0xff] %v1267_v19  ;;  %v1269_v45 = vadd.f32 %v2373_v43, %v864_v24  ;;  %v1270_v46 = vadd.f32 %v2384_v50, %v865_v25  ;;  %v1271_v47 = vadd.f32 %v2394_v56, %v866_v3  ;;  %v870_v11 = vmul.f32 %v2230_v16, %v465_v9  ;;  %v474_v25 = vld [vmem:[%s2195_s19 + $0x808] sm:$0xff] }
 0x10e   : > { %1572 = vst [vmem:[%s2285_s23 + $0x788] sm:$0xff] %v1268_v5  ;;  %v1272_v40 = vadd.f32 %v2406_v63, %v867_v31  ;;  %v1273_v58 = vadd.f32 %v2418_v29, %v868_v36  ;;  %v1274_v61 = vadd.f32 %v2226_v14, %v869_v6  ;;  %v871_v62 = vmul.f32 %v2238_v20, %v466_v30  ;;  %v475_v36 = vld [vmem:[%s2195_s19 + $0x810] sm:$0xff]  ;;  %v476_v6 = vld [vmem:[%s2195_s19 + $0x818] sm:$0xff] }
 0x10f   : > { %1573 = vst [vmem:[%s2285_s23 + $0x790] sm:$0xff] %v1269_v45  ;;  %1574 = vst [vmem:[%s2285_s23 + $0x798] sm:$0xff] %v1270_v46  ;;  %v1275_v8 = vadd.f32 %v2233_v17, %v870_v11  ;;  %v872_v9 = vmul.f32 %v2244_v22, %v467_v4  ;;  %v873_v19 = vmul.f32 %v2253_v27, %v468_v37  ;;  %v477_v4 = vld [vmem:[%s2195_s19 + $0x820] sm:$0xff]  ;;  %v479_v11 = vld [vmem:[%s2195_s19 + $0x830] sm:$0xff] }
 0x110   : > { %1575 = vst [vmem:[%s2285_s23 + $0x7a0] sm:$0xff] %v1271_v47  ;;  %v874_v24 = vmul.f32 %v2262_v32, %v469_v41  ;;  %1576 = vst [vmem:[%s2285_s23 + $0x7a8] sm:$0xff] %v1272_v40  ;;  %v1276_v3 = vadd.f32 %v2241_v21, %v871_v62  ;;  %v875_v30 = vmul.f32 %v2272_v38, %v470_v39  ;;  %v478_v47 = vld [vmem:[%s2195_s19 + $0x828] sm:$0xff]  ;;  %v480_v39 = vld [vmem:[%s2195_s19 + $0x838] sm:$0xff] }
 0x111   : > { %1577 = vst [vmem:[%s2285_s23 + $0x7b0] sm:$0xff] %v1273_v58  ;;  %1578 = vst [vmem:[%s2285_s23 + $0x7b8] sm:$0xff] %v1274_v61  ;;  %v876_v5 = vmul.f32 %v2292_v48, %v471_v52  ;;  %v877_v31 = vmul.f32 %v2303_v53, %v472_v12  ;;  %v1277_v37 = vadd.f32 %v2247_v23, %v872_v9  ;;  %v481_v61 = vld [vmem:[%s2195_s19 + $0x840] sm:$0xff] }
 0x112   : > { %1579 = vst [vmem:[%s2285_s23 + $0x7c0] sm:$0xff] %v1275_v8  ;;  %v1278_v41 = vadd.f32 %v2256_v28, %v873_v19  ;;  %v1279_v45 = vadd.f32 %v2265_v33, %v874_v24  ;;  %v878_v46 = vmul.f32 %v2310_v55, %v473_v7  ;;  %1580 = vst [vmem:[%s2285_s23 + $0x7c8] sm:$0xff] %v1276_v3  ;;  %v482_v19 = vld [vmem:[%s2195_s19 + $0x848] sm:$0xff] }
 0x113   : > { %v1280_v52 = vadd.f32 %v2280_v44, %v875_v30  ;;  %v1281_v12 = vadd.f32 %v2295_v49, %v876_v5  ;;  %v1282_v40 = vadd.f32 %v2307_v54, %v877_v31  ;;  %v879_v58 = vmul.f32 %v2321_v60, %v474_v25  ;;  %1581 = vst [vmem:[%s2285_s23 + $0x7d0] sm:$0xff] %v1277_v37  ;;  %v483_v5 = vld [vmem:[%s2195_s19 + $0x850] sm:$0xff]  ;;  %v484_v31 = vld [vmem:[%s2195_s19 + $0x858] sm:$0xff] }
 0x114   : > { %1582 = vst [vmem:[%s2285_s23 + $0x7d8] sm:$0xff] %v1278_v41  ;;  %1583 = vst [vmem:[%s2285_s23 + $0x7e0] sm:$0xff] %v1279_v45  ;;  %v1283_v62 = vadd.f32 %v2318_v59, %v878_v46  ;;  %v880_v7 = vmul.f32 %v2332_v1, %v475_v36  ;;  %v881_v8 = vmul.f32 %v2343_v18, %v476_v6  ;;  %v485_v36 = vld [vmem:[%s2195_s19 + $0x860] sm:$0xff]  ;;  %v486_v45 = vld [vmem:[%s2195_s19 + $0x868] sm:$0xff] }
 0x115   : > { %v882_v9 = vmul.f32 %v2357_v34, %v477_v4  ;;  %1584 = vst [vmem:[%s2285_s23 + $0x7e8] sm:$0xff] %v1280_v52  ;;  %1585 = vst [vmem:[%s2285_s23 + $0x7f0] sm:$0xff] %v1281_v12  ;;  %v1284_v24 = vadd.f32 %v2329_v0, %v879_v58  ;;  %v883_v25 = vmul.f32 %v2369_v42, %v478_v47  ;;  %v487_v46 = vld [vmem:[%s2195_s19 + $0x870] sm:$0xff]  ;;  %v488_v47 = vld [vmem:[%s2195_s19 + $0x878] sm:$0xff] }
 0x116   : > { %1586 = vst [vmem:[%s2285_s23 + $0x7f8] sm:$0xff] %v1282_v40  ;;  %v884_v3 = vmul.f32 %v2376_v10, %v479_v11  ;;  %v885_v30 = vmul.f32 %v2387_v51, %v480_v39  ;;  %1587 = vst [vmem:[%s2285_s23 + $0x800] sm:$0xff] %v1283_v62  ;;  %v1285_v6 = vadd.f32 %v2340_v15, %v880_v7  ;;  %v489_v40 = vld [vmem:[%s2195_s19 + $0x880] sm:$0xff] }
 0x117   : > { %v1286_v4 = vadd.f32 %v2350_v26, %v881_v8  ;;  %v1287_v37 = vadd.f32 %v2361_v35, %v882_v9  ;;  %v886_v41 = vmul.f32 %v2397_v57, %v481_v61  ;;  %1588 = vst [vmem:[%s2285_s23 + $0x808] sm:$0xff] %v1284_v24  ;;  %v1288_v11 = vadd.f32 %v2373_v43, %v883_v25  ;;  %v490_v8 = vld [vmem:[%s2195_s19 + $0x888] sm:$0xff] }
 0x118   : > { %v1289_v39 = vadd.f32 %v2384_v50, %v884_v3  ;;  %v1290_v52 = vadd.f32 %v2394_v56, %v885_v30  ;;  %v887_v12 = vmul.f32 %v2409_v2, %v482_v19  ;;  %1589 = vst [vmem:[%s2285_s23 + $0x810] sm:$0xff] %v1285_v6  ;;  %v888_v61 = vmul.f32 %v2223_v13, %v483_v5  ;;  %v491_v3 = vld [vmem:[%s2195_s19 + $0x890] sm:$0xff]  ;;  %v492_v30 = vld [vmem:[%s2195_s19 + $0x898] sm:$0xff]  ;;  %v493_v5 = vld [vmem:[%s2195_s19 + $0x8a0] sm:$0xff] }
 0x119   : > { %1590 = vst [vmem:[%s2285_s23 + $0x818] sm:$0xff] %v1286_v4  ;;  %1591 = vst [vmem:[%s2285_s23 + $0x820] sm:$0xff] %v1287_v37  ;;  %v1291_v58 = vadd.f32 %v2406_v63, %v886_v41  ;;  %v889_v62 = vmul.f32 %v2230_v16, %v484_v31  ;;  %v890_v7 = vmul.f32 %v2238_v20, %v485_v36  ;;  %v494_v37 = vld [vmem:[%s2195_s19 + $0x8a8] sm:$0xff]  ;;  %v495_v41 = vld [vmem:[%s2195_s19 + $0x8b0] sm:$0xff] }
 0x11a   : > { %1592 = vst [vmem:[%s2285_s23 + $0x828] sm:$0xff] %v1288_v11  ;;  %1593 = vst [vmem:[%s2285_s23 + $0x830] sm:$0xff] %v1289_v39  ;;  %v1292_v9 = vadd.f32 %v2418_v29, %v887_v12  ;;  %v891_v19 = vmul.f32 %v2244_v22, %v486_v45  ;;  %v892_v24 = vmul.f32 %v2253_v27, %v487_v46  ;;  %v496_v45 = vld [vmem:[%s2195_s19 + $0x8b8] sm:$0xff] }
 0x11b   : > { %1594 = vst [vmem:[%s2285_s23 + $0x838] sm:$0xff] %v1290_v52  ;;  %v893_v25 = vmul.f32 %v2262_v32, %v488_v47  ;;  %1595 = vst [vmem:[%s2285_s23 + $0x840] sm:$0xff] %v1291_v58  ;;  %v1293_v31 = vadd.f32 %v2226_v14, %v888_v61  ;;  %v1294_v36 = vadd.f32 %v2233_v17, %v889_v62  ;;  %v497_v52 = vld [vmem:[%s2195_s19 + $0x8c0] sm:$0xff]  ;;  %v498_v62 = vld [vmem:[%s2195_s19 + $0x8c8] sm:$0xff] }
 0x11c   : > { %v1295_v6 = vadd.f32 %v2241_v21, %v890_v7  ;;  %v894_v4 = vmul.f32 %v2272_v38, %v489_v40  ;;  %1596 = vst [vmem:[%s2285_s23 + $0x848] sm:$0xff] %v1292_v9  ;;  %v1296_v46 = vadd.f32 %v2247_v23, %v891_v19  ;;  %v1297_v47 = vadd.f32 %v2256_v28, %v892_v24  ;;  %v499_v24 = vld [vmem:[%s2195_s19 + $0x8d0] sm:$0xff] }
 0x11d   : > { %v1298_v11 = vadd.f32 %v2265_v33, %v893_v25  ;;  %v895_v39 = vmul.f32 %v2292_v48, %v490_v8  ;;  %1597 = vst [vmem:[%s2285_s23 + $0x850] sm:$0xff] %v1293_v31  ;;  %1598 = vst [vmem:[%s2285_s23 + $0x858] sm:$0xff] %v1294_v36  ;;  %v896_v40 = vmul.f32 %v2303_v53, %v491_v3  ;;  %v500_v25 = vld [vmem:[%s2195_s19 + $0x8d8] sm:$0xff]  ;;  %v501_v3 = vld [vmem:[%s2195_s19 + $0x8e0] sm:$0xff] }
 0x11e   : > { %1599 = vst [vmem:[%s2285_s23 + $0x860] sm:$0xff] %v1295_v6  ;;  %v1299_v12 = vadd.f32 %v2280_v44, %v894_v4  ;;  %v897_v58 = vmul.f32 %v2310_v55, %v492_v30  ;;  %v898_v61 = vmul.f32 %v2321_v60, %v493_v5  ;;  %1600 = vst [vmem:[%s2285_s23 + $0x868] sm:$0xff] %v1296_v46  ;;  %v502_v6 = vld [vmem:[%s2195_s19 + $0x8e8] sm:$0xff]  ;;  %v503_v4 = vld [vmem:[%s2195_s19 + $0x8f0] sm:$0xff] }
 0x11f   : > { %1601 = vst [vmem:[%s2285_s23 + $0x870] sm:$0xff] %v1297_v47  ;;  %1602 = vst [vmem:[%s2285_s23 + $0x878] sm:$0xff] %v1298_v11  ;;  %v1300_v7 = vadd.f32 %v2295_v49, %v895_v39  ;;  %v899_v8 = vmul.f32 %v2332_v1, %v494_v37  ;;  %v900_v9 = vmul.f32 %v2343_v18, %v495_v41  ;;  %v504_v37 = vld [vmem:[%s2195_s19 + $0x8f8] sm:$0xff]  ;;  %v505_v11 = vld [vmem:[%s2195_s19 + $0x900] sm:$0xff] }
 0x120   : > { %v901_v19 = vmul.f32 %v2357_v34, %v496_v45  ;;  %1603 = vst [vmem:[%s2285_s23 + $0x880] sm:$0xff] %v1299_v12  ;;  %v1301_v30 = vadd.f32 %v2307_v54, %v896_v40  ;;  %v1302_v5 = vadd.f32 %v2318_v59, %v897_v58  ;;  %v1303_v31 = vadd.f32 %v2329_v0, %v898_v61  ;;  %v506_v58 = vld [vmem:[%s2195_s19 + $0x908] sm:$0xff] }
 0x121   : > { %v902_v36 = vmul.f32 %v2369_v42, %v497_v52  ;;  %1604 = vst [vmem:[%s2285_s23 + $0x888] sm:$0xff] %v1300_v7  ;;  %v1304_v41 = vadd.f32 %v2340_v15, %v899_v8  ;;  %v1305_v45 = vadd.f32 %v2350_v26, %v900_v9  ;;  %v903_v47 = vmul.f32 %v2376_v10, %v498_v62  ;;  %v507_v9 = vld [vmem:[%s2195_s19 + $0x910] sm:$0xff] }
 0x122   : > { %v1306_v46 = vadd.f32 %v2361_v35, %v901_v19  ;;  %1605 = vst [vmem:[%s2285_s23 + $0x890] sm:$0xff] %v1301_v30  ;;  %1606 = vst [vmem:[%s2285_s23 + $0x898] sm:$0xff] %v1302_v5  ;;  %v904_v52 = vmul.f32 %v2387_v51, %v499_v24  ;;  %v905_v12 = vmul.f32 %v2397_v57, %v500_v25  ;;  %v508_v19 = vld [vmem:[%s2195_s19 + $0x918] sm:$0xff]  ;;  %v509_v24 = vld [vmem:[%s2195_s19 + $0x920] sm:$0xff] }
 0x123   : > { %1607 = vst [vmem:[%s2285_s23 + $0x8a0] sm:$0xff] %v1303_v31  ;;  %v1307_v39 = vadd.f32 %v2373_v43, %v902_v36  ;;  %v906_v40 = vmul.f32 %v2409_v2, %v501_v3  ;;  %1608 = vst [vmem:[%s2285_s23 + $0x8a8] sm:$0xff] %v1304_v41  ;;  %v1308_v61 = vadd.f32 %v2384_v50, %v903_v47  ;;  %v510_v5 = vld [vmem:[%s2195_s19 + $0x928] sm:$0xff] }
 0x124   : > { %1609 = vst [vmem:[%s2285_s23 + $0x8b0] sm:$0xff] %v1305_v45  ;;  %1610 = vst [vmem:[%s2285_s23 + $0x8b8] sm:$0xff] %v1306_v46  ;;  %v907_v62 = vmul.f32 %v2223_v13, %v502_v6  ;;  %v908_v7 = vmul.f32 %v2230_v16, %v503_v4  ;;  %v909_v8 = vmul.f32 %v2238_v20, %v504_v37  ;;  %v511_v16 = vld [vmem:[%s2195_s19 + $0x930] sm:$0xff]  ;;  %v512_v20 = vld [vmem:[%s2195_s19 + $0x938] sm:$0xff] }
 0x125   : > { %1611 = vst [vmem:[%s2285_s23 + $0x8c0] sm:$0xff] %v1307_v39  ;;  %v1309_v25 = vadd.f32 %v2394_v56, %v904_v52  ;;  %v1310_v3 = vadd.f32 %v2406_v63, %v905_v12  ;;  %v1311_v30 = vadd.f32 %v2418_v29, %v906_v40  ;;  %v910_v13 = vmul.f32 %v2244_v22, %v505_v11  ;;  %v513_v37 = vld [vmem:[%s2195_s19 + $0x940] sm:$0xff]  ;;  %v514_v45 = vld [vmem:[%s2195_s19 + $0x948] sm:$0xff]  ;;  %v516_v46 = vld [vmem:[%s2195_s19 + $0x958] sm:$0xff] }
 0x126   : > { %1612 = vst [vmem:[%s2285_s23 + $0x8c8] sm:$0xff] %v1308_v61  ;;  %v1312_v31 = vadd.f32 %v2226_v14, %v907_v62  ;;  %v1313_v36 = vadd.f32 %v2233_v17, %v908_v7  ;;  %v1314_v6 = vadd.f32 %v2241_v21, %v909_v8  ;;  %v911_v4 = vmul.f32 %v2253_v27, %v506_v58  ;;  %v518_v39 = vld [vmem:[%s2195_s19 + $0x968] sm:$0xff] }
 0x127   : > { %1613 = vst [vmem:[%s2285_s23 + $0x8d0] sm:$0xff] %v1309_v25  ;;  %1614 = vst [vmem:[%s2285_s23 + $0x8d8] sm:$0xff] %v1310_v3  ;;  %v1315_v22 = vadd.f32 %v2247_v23, %v910_v13  ;;  %v912_v41 = vmul.f32 %v2262_v32, %v507_v9  ;;  %v913_v14 = vmul.f32 %v2272_v38, %v508_v19  ;;  %v515_v38 = vld [vmem:[%s2195_s19 + $0x950] sm:$0xff] }
 0x128   : > { %1615 = vst [vmem:[%s2285_s23 + $0x8e0] sm:$0xff] %v1311_v30  ;;  %v914_v17 = vmul.f32 %v2292_v48, %v509_v24  ;;  %1616 = vst [vmem:[%s2285_s23 + $0x8e8] sm:$0xff] %v1312_v31  ;;  %v1316_v21 = vadd.f32 %v2256_v28, %v911_v4  ;;  %v915_v27 = vmul.f32 %v2303_v53, %v510_v5  ;;  %v517_v48 = vld [vmem:[%s2195_s19 + $0x960] sm:$0xff] }
 0x129   : > { %1617 = vst [vmem:[%s2285_s23 + $0x8f0] sm:$0xff] %v1313_v36  ;;  %1618 = vst [vmem:[%s2285_s23 + $0x8f8] sm:$0xff] %v1314_v6  ;;  %v916_v23 = vmul.f32 %v2310_v55, %v511_v16  ;;  %v917_v32 = vmul.f32 %v2321_v60, %v512_v20  ;;  %v1317_v47 = vadd.f32 %v2265_v33, %v912_v41  ;;  %v519_v55 = vld [vmem:[%s2195_s19 + $0x970] sm:$0xff]  ;;  %v520_v60 = vld [vmem:[%s2195_s19 + $0x978] sm:$0xff] }
 0x12a   : > { %1619 = vst [vmem:[%s2285_s23 + $0x900] sm:$0xff] %v1315_v22  ;;  %v1318_v11 = vadd.f32 %v2280_v44, %v913_v14  ;;  %v1319_v28 = vadd.f32 %v2295_v49, %v914_v17  ;;  %v918_v53 = vmul.f32 %v2332_v1, %v513_v37  ;;  %1620 = vst [vmem:[%s2285_s23 + $0x908] sm:$0xff] %v1316_v21 }
 0x12b   : > { %v1320_v52 = vadd.f32 %v2307_v54, %v915_v27  ;;  %v1321_v12 = vadd.f32 %v2318_v59, %v916_v23  ;;  %v1322_v33 = vadd.f32 %v2329_v0, %v917_v32  ;;  %v919_v44 = vmul.f32 %v2343_v18, %v514_v45  ;;  %1621 = vst [vmem:[%s2285_s23 + $0x910] sm:$0xff] %v1317_v47 }
 0x12c   : > { %1622 = vst [vmem:[%s2285_s23 + $0x918] sm:$0xff] %v1318_v11  ;;  %1623 = vst [vmem:[%s2285_s23 + $0x920] sm:$0xff] %v1319_v28  ;;  %v1323_v49 = vadd.f32 %v2340_v15, %v918_v53  ;;  %v920_v1 = vmul.f32 %v2357_v34, %v515_v38  ;;  %v921_v40 = vmul.f32 %v2369_v42, %v516_v46 }
 0x12d   : > { %v922_v54 = vmul.f32 %v2376_v10, %v517_v48  ;;  %1624 = vst [vmem:[%s2285_s23 + $0x928] sm:$0xff] %v1320_v52  ;;  %1625 = vst [vmem:[%s2285_s23 + $0x930] sm:$0xff] %v1321_v12  ;;  %v1324_v59 = vadd.f32 %v2350_v26, %v919_v44  ;;  %v923_v0 = vmul.f32 %v2387_v51, %v518_v39 }
 0x12e   : > { %1626 = vst [vmem:[%s2285_s23 + $0x938] sm:$0xff] %v1322_v33  ;;  %v924_v15 = vmul.f32 %v2397_v57, %v519_v55  ;;  %v925_v18 = vmul.f32 %v2409_v2, %v520_v60  ;;  %1627 = vst [vmem:[%s2285_s23 + $0x940] sm:$0xff] %v1323_v49  ;;  %v1325_v34 = vadd.f32 %v2361_v35, %v920_v1 }
 0x12f   : > { %v1326_v42 = vadd.f32 %v2373_v43, %v921_v40  ;;  %v1327_v10 = vadd.f32 %v2384_v50, %v922_v54  ;;  %1628 = vst [vmem:[%s2285_s23 + $0x948] sm:$0xff] %v1324_v59  ;;  %v1328_v26 = vadd.f32 %v2394_v56, %v923_v0 }
 0x130   : > { %v1329_v51 = vadd.f32 %v2406_v63, %v924_v15  ;;  %v1330_v35 = vadd.f32 %v2418_v29, %v925_v18  ;;  %1629 = vst [vmem:[%s2285_s23 + $0x950] sm:$0xff] %v1325_v34 }
 0x131   : > { %1630 = vst [vmem:[%s2285_s23 + $0x958] sm:$0xff] %v1326_v42  ;;  %1631 = vst [vmem:[%s2285_s23 + $0x960] sm:$0xff] %v1327_v10 }
 0x132   : > { %1632 = vst [vmem:[%s2285_s23 + $0x968] sm:$0xff] %v1328_v26  ;;  %1633 = vst [vmem:[%s2285_s23 + $0x970] sm:$0xff] %v1329_v51 }
 0x133   : > { %1634 = vst [vmem:[%s2285_s23 + $0x978] sm:$0xff] %v1330_v35 }
 0x134   : > { %1932 = shalt.err (!%p1929_p6)
}
 0x135   : > { %s1933_s6 = scalar_lea.hbm %s3560_s10, 38912  ;;  %s1937_s29 = scalar_lea.hbm %s3619_s3, 77824 }
 0x136   : > { %p1934_p12 = scmp.ne.s32.totalorder %s3560_s10, %s1933_s6  ;;  %p1938_p11 = scmp.lt.u32.totalorder %s3560_s10, %s3619_s3 }
 0x137   : > { %p1939_p7 = scmp.lt.u32.totalorder %s1937_s29, %s1933_s6  ;;  %p1941_p8 = scmp.lt.u32.totalorder %s1933_s6, %s3560_s10 }
 0x138   : > { %p1935_p13 = pnand %p1934_p12, %p3638_p4 }
 0x139   : > { %p1940_p3 = por %p1939_p7, %p1938_p11 }
 0x13a   : > { %p1936_p1 = pneg %p1935_p13 }
 0x13b   : > { %p1942_p5 = por %p1941_p8, %p1940_p3 }
 0x13d   : > { %p1943_p10 = pnand %p1942_p5, %p1936_p1 }
 0x13f   : > { %1946 = shalt.err (!%p1943_p10)
}
 0x140   : > { %s1997_s19 = smov 2432   ;;  %s1998_s23 = smov 152  }
 0x141   : > { %1772 = dma.vmem_to_hbm [thread:$0]  (%p3638_p4), %s3562_s30, 38912, %s3560_s10, %s1636_s11, %s1997_s19, %s1997_s19, %s1998_s23  }
 0x142 PF: > { %s1665_s26 = sand.u32 1, %s1977_s12   ;;  %p3639_p2 = scmp.ne.s32.totalorder %s3628_s25, 0 }
 0x143   : > { %p3640_p0 = scmp.ge.s32.totalorder %s1989_s15, 2  ;;  %s1666_s16 = scalar_lea.sflag [#allocation4], %s1665_s26 }
 0x145   : > { %p1786_p9 = pnand %p3640_p0, %p3639_p2 }
 0x147   : > { %1972 = dma.done.wait (!%p1786_p9), %s1666_s16, 38912  }
 0x148   : > { %1974 = vsyncadd (!%p1786_p9), %s1666_s16, 4294928384  ;;  %p17_p6 = scmp.ge.s32.totalorder %s2044_s18, 4   ;;  %s3641_s12 = smov %s1981_s13 }
 0x149   : > { %s3642_s13 = smov %s1985_s14  ;;  %s3643_s14 = smov %s2056_s21 }
 0x14a   : > { %s3644_s15 = smov %s2044_s18  ;;  %19 = sbr.rel (!%p17_p6) target bundleno = 6 (0x6), region = 85 }
 0x151   :  { %1671 = vsyncpa [#allocation3], 1 }
 0x152   :  { %1673 = vsyncpa [#allocation3 + $0x1], 1 }
 0x153   :  { %1674 = vsyncpa [#allocation6], 1 }
 0x154   :  { %1675 = vsyncpa [#allocation4], 1 }
 0x155   :  { %1677 = vsyncpa [#allocation4 + $0x1], 1 }

</bundles_post_ra>
